<compile_context>
chip_gen: v7x
topology: tpu7x:2x2x1
jax: 0.10.0
libtpu: 0.0.40
codegen_flags: <defaults>
</compile_context>

<pallas_src>
import jax
import jax.numpy as jnp
from jax.experimental import pallas as pl
from jax.experimental.pallas import tpu as pltpu

LANE = 128          # lane width; every feature dim is padded to this
TB = 128            # batch tile (fills MXU rows)
NUM_SLOTS = 7       # we1, we2, wmu, wvar, wd1, wd2, wd3


def vae_forward_kernel(x_ref, eps_ref, w_ref, b_ref, out_ref):
    """One batch tile of the full VAE forward.

    x_ref   : (TB, 128)          padded inputs
    eps_ref : (TB, 128)          padded reparameterization noise
    w_ref   : (128, 7*128)       packed padded weights (in, out) per 128-lane slot
    b_ref   : (1, 7*128)         packed padded biases
    out_ref : (TB, 3*128)        [recon | mu | log_var] lane-dense slab
    """

    def w(i):  # static lane slice of the packed weight slab -> (128, 128) view
        return w_ref[:, i * LANE:(i + 1) * LANE]

    def b(i):  # static lane slice of the packed bias slab -> (1, 128) view
        return b_ref[:, i * LANE:(i + 1) * LANE]

    x = x_ref[...]

    # ---- encoder: Linear -> ReLU -> Linear ----
    h = jnp.maximum(
        jnp.dot(x, w(0), preferred_element_type=jnp.float32) + b(0), 0.0)
    lat = jnp.dot(h, w(1), preferred_element_type=jnp.float32) + b(1)

    # ---- latent heads: fc_mu & fc_var fused into one 128->256 matmul ----
    head = (jnp.dot(lat, w_ref[:, 2 * LANE:4 * LANE],
                    preferred_element_type=jnp.float32)
            + b_ref[:, 2 * LANE:4 * LANE])
    mu = head[:, :LANE]
    log_var = head[:, LANE:]

    # ---- reparameterize: z = eps * exp(0.5 * logvar) + mu  (f32 on VPU/EUP) ----
    z = eps_ref[...] * jnp.exp(0.5 * log_var) + mu

    # ---- decoder: Linear -> ReLU -> Linear -> ReLU -> Linear ----
    d = jnp.maximum(
        jnp.dot(z, w(4), preferred_element_type=jnp.float32) + b(4), 0.0)
    d = jnp.maximum(
        jnp.dot(d, w(5), preferred_element_type=jnp.float32) + b(5), 0.0)
    recon = jnp.dot(d, w(6), preferred_element_type=jnp.float32) + b(6)

    # ---- single lane-dense output slab: [recon | mu | log_var] ----
    out_ref[:, 0 * LANE:1 * LANE] = recon.astype(out_ref.dtype)
    out_ref[:, 1 * LANE:2 * LANE] = mu.astype(out_ref.dtype)
    out_ref[:, 2 * LANE:3 * LANE] = log_var.astype(out_ref.dtype)


def _pad2d(a, rows, cols):
    """Zero-pad a 2-D array up to (rows, cols)."""
    return jnp.zeros((rows, cols), a.dtype).at[:a.shape[0], :a.shape[1]].set(a)


def pack_params(p):
    """Pack the 7 (in,out) weights / (1,out) biases into lane-padded slabs.

    Slot order: we1, we2, wmu, wvar, wd1, wd2, wd3.
    Returns w_packed (128, 7*128) and b_packed (1, 7*128), zero padded.
    """
    w_slots = [p["we1"], p["we2"], p["wmu"], p["wvar"], p["wd1"], p["wd2"], p["wd3"]]
    b_slots = [p["be1"], p["be2"], p["bmu"], p["bvar"], p["bd1"], p["bd2"], p["bd3"]]
    for wm in w_slots:
        assert wm.shape[0] <= LANE and wm.shape[1] <= LANE, "feature dim > 128 needs tiling"
    w_packed = jnp.concatenate([_pad2d(wm, LANE, LANE) for wm in w_slots], axis=1)
    b_packed = jnp.concatenate([_pad2d(bv.reshape(1, -1), 1, LANE) for bv in b_slots], axis=1)
    return w_packed, b_packed


def vanilla_vae_forward(x, eps, w_packed, b_packed, *, n_actions):
    """Returns [recon, inputs, mu, log_var] like the PyTorch module."""
    B, input_shape = x.shape
    B_pad = pl.cdiv(B, TB) * TB
    OUT = 3 * LANE

    # Pad batch and lanes (zero padding is exact for this forward pass).
    x_p = _pad2d(x, B_pad, LANE)
    eps_p = _pad2d(eps, B_pad, LANE)

    flops = 2 * B_pad * LANE * LANE * NUM_SLOTS
    bytes_accessed = 4 * (x_p.size + eps_p.size + w_packed.size
                          + b_packed.size + B_pad * OUT)

    out = pl.pallas_call(
        vae_forward_kernel,
        out_shape=jax.ShapeDtypeStruct((B_pad, OUT), jnp.float32),
        grid=(B_pad // TB,),
        in_specs=[
            pl.BlockSpec((TB, LANE), lambda i: (i, 0)),             # x tile
            pl.BlockSpec((TB, LANE), lambda i: (i, 0)),             # eps tile
            pl.BlockSpec((LANE, NUM_SLOTS * LANE), lambda i: (0, 0)),  # weights (resident)
            pl.BlockSpec((1, NUM_SLOTS * LANE), lambda i: (0, 0)),     # biases (resident)
        ],
        out_specs=pl.BlockSpec((TB, OUT), lambda i: (i, 0)),
        compiler_params=pltpu.CompilerParams(
            dimension_semantics=("parallel",)),
        cost_estimate=pl.CostEstimate(
            flops=flops,
            transcendentals=B_pad * LANE,
            bytes_accessed=bytes_accessed),
    )(x_p, eps_p, w_packed, b_packed)

    recon = out[:B, :input_shape]
    mu = out[:B, LANE:LANE + n_actions]
    log_var = out[:B, 2 * LANE:2 * LANE + n_actions]
    return [recon, x, mu, log_var]


def init_params(key, input_shape, vae_hidden_dim, latent_dim, n_actions):
    """Deterministic synthetic parameter init (weights (in, out), biases (1, out))."""
    def lin(k, fan_in, fan_out):
        kw, kb = jax.random.split(k)
        bound = 1.0 / jnp.sqrt(fan_in)
        w = jax.random.uniform(kw, (fan_in, fan_out), jnp.float32, -bound, bound)
        b = jax.random.uniform(kb, (1, fan_out), jnp.float32, -bound, bound)
        return w, b

    keys = jax.random.split(key, 8)
    we1, be1 = lin(keys[0], input_shape, vae_hidden_dim)
    we2, be2 = lin(keys[1], vae_hidden_dim, latent_dim)
    wmu, bmu = lin(keys[2], latent_dim, n_actions)
    wvar, bvar = lin(keys[3], latent_dim, n_actions)
    wd1, bd1 = lin(keys[4], n_actions, vae_hidden_dim)
    wd2, bd2 = lin(keys[5], vae_hidden_dim, vae_hidden_dim)
    wd3, bd3 = lin(keys[6], vae_hidden_dim, input_shape)
    return dict(
        we1=we1, be1=be1, we2=we2, be2=be2,
        wmu=wmu, bmu=bmu, wvar=wvar, bvar=bvar,
        wd1=wd1, bd1=bd1, wd2=wd2, bd2=bd2, wd3=wd3, bd3=bd3,
    )


def reference_forward(x, eps, p):
    """Plain-JAX reference for correctness checking."""
    h = jnp.maximum(x @ p["we1"] + p["be1"], 0.0)
    lat = h @ p["we2"] + p["be2"]
    mu = lat @ p["wmu"] + p["bmu"]
    log_var = lat @ p["wvar"] + p["bvar"]
    z = eps * jnp.exp(0.5 * log_var) + mu
    d = jnp.maximum(z @ p["wd1"] + p["bd1"], 0.0)
    d = jnp.maximum(d @ p["wd2"] + p["bd2"], 0.0)
    recon = d @ p["wd3"] + p["bd3"]
    return recon, mu, log_var


if __name__ == "__main__":
    # Model dims match the original module's Linear stack; batch raised to 256
    # (2 grid tiles of 128) so the MXU M-dimension is filled and the "parallel"
    # batch axis actually exercises multi-core sharding on v7x.
    batch = 256
    input_shape = 32        # flattened observation size
    vae_hidden_dim = 64     # args.vae_hidden_dim
    latent_dim = 16         # args.latent_dim
    n_actions = 8           # args.n_actions

    key = jax.random.PRNGKey(0)
    k_params, k_x, k_eps = jax.random.split(key, 3)

    params = init_params(k_params, input_shape, vae_hidden_dim, latent_dim, n_actions)
    w_packed, b_packed = pack_params(params)

    x = jax.random.normal(k_x, (batch, input_shape), jnp.float32)
    # Reparameterization noise eps ~ N(0,1) generated host-side for determinism.
    eps = jax.random.normal(k_eps, (batch, n_actions), jnp.float32)

    recon, inputs_out, mu, log_var = vanilla_vae_forward(
        x, eps, w_packed, b_packed, n_actions=n_actions)
    jax.block_until_ready((recon, inputs_out, mu, log_var))

    # Verify against plain-JAX reference.
    r_ref, mu_ref, lv_ref = reference_forward(x, eps, params)
    assert jnp.allclose(recon, r_ref, atol=1e-5, rtol=1e-5)
    assert jnp.allclose(mu, mu_ref, atol=1e-5, rtol=1e-5)
    assert jnp.allclose(log_var, lv_ref, atol=1e-5, rtol=1e-5)
    assert jnp.array_equal(inputs_out, x)

    print("KERNEL_OK")
</pallas_src>

<mosaic_0001>
module attributes {stable_mosaic.version = 11 : i64} {
  func.func @vae_forward_kernel(%arg0: i32, %arg1: memref<128x128xf32, #tpu.memory_space<vmem>>, %arg2: memref<128x128xf32, #tpu.memory_space<vmem>>, %arg3: memref<128x896xf32, #tpu.memory_space<vmem>>, %arg4: memref<1x896xf32, #tpu.memory_space<vmem>>, %arg5: memref<128x384xf32, #tpu.memory_space<vmem>>) attributes {dimension_semantics = [#tpu.dimension_semantics<parallel>], iteration_bounds = array<i64: 2>, scalar_prefetch = 0 : i64, scratch_operands = 0 : i64, tpu.core_type = #tpu.core_type<tc>, window_params = [{transform_indices = @transform_0, window_bounds = array<i64: 128, 128>}, {transform_indices = @transform_1, window_bounds = array<i64: 128, 128>}, {pipeline_mode = #tpu.pipeline_mode<synchronous>, transform_indices = @transform_2, window_bounds = array<i64: 128, 896>}, {pipeline_mode = #tpu.pipeline_mode<synchronous>, transform_indices = @transform_3, window_bounds = array<i64: 1, 896>}, {transform_indices = @transform_4, window_bounds = array<i64: 128, 384>}]} {
    %c0 = arith.constant 0 : index
    %c0_0 = arith.constant 0 : index
    %0 = vector.load %arg1[%c0, %c0_0] : memref<128x128xf32, #tpu.memory_space<vmem>>, vector<128x128xf32>
    %c0_1 = arith.constant 0 : index
    %c0_2 = arith.constant 0 : index
    %1 = vector.load %arg3[%c0_1, %c0_2] : memref<128x896xf32, #tpu.memory_space<vmem>>, vector<128x128xf32>
    %cst = arith.constant dense<0.000000e+00> : vector<128x128xf32>
    %2 = tpu.matmul %0, %1, %cst {dimension_numbers = #tpu.dot_dimension_numbers<[1], [0], [0], [1], [0, 0, 1, 1], [], []>} : vector<128x128xf32>, vector<128x128xf32>, vector<128x128xf32> -> vector<128x128xf32>
    %c0_3 = arith.constant 0 : index
    %c0_4 = arith.constant 0 : index
    %3 = vector.load %arg4[%c0_3, %c0_4] : memref<1x896xf32, #tpu.memory_space<vmem>>, vector<1x128xf32>
    %4 = vector.broadcast %3 : vector<1x128xf32> to vector<128x128xf32>
    %5 = arith.addf %2, %4 : vector<128x128xf32>
    %cst_5 = arith.constant 0.000000e+00 : f32
    %6 = vector.broadcast %cst_5 : f32 to vector<128x128xf32>
    %7 = arith.maximumf %5, %6 : vector<128x128xf32>
    %c0_6 = arith.constant 0 : index
    %c128 = arith.constant 128 : index
    %8 = vector.load %arg3[%c0_6, %c128] : memref<128x896xf32, #tpu.memory_space<vmem>>, vector<128x128xf32>
    %cst_7 = arith.constant dense<0.000000e+00> : vector<128x128xf32>
    %9 = tpu.matmul %7, %8, %cst_7 {dimension_numbers = #tpu.dot_dimension_numbers<[1], [0], [0], [1], [0, 0, 1, 1], [], []>} : vector<128x128xf32>, vector<128x128xf32>, vector<128x128xf32> -> vector<128x128xf32>
    %c0_8 = arith.constant 0 : index
    %c128_9 = arith.constant 128 : index
    %10 = vector.load %arg4[%c0_8, %c128_9] : memref<1x896xf32, #tpu.memory_space<vmem>>, vector<1x128xf32>
    %11 = vector.broadcast %10 : vector<1x128xf32> to vector<128x128xf32>
    %12 = arith.addf %9, %11 : vector<128x128xf32>
    %c0_10 = arith.constant 0 : index
    %c256 = arith.constant 256 : index
    %13 = vector.load %arg3[%c0_10, %c256] : memref<128x896xf32, #tpu.memory_space<vmem>>, vector<128x256xf32>
    %cst_11 = arith.constant dense<0.000000e+00> : vector<128x256xf32>
    %14 = tpu.matmul %12, %13, %cst_11 {dimension_numbers = #tpu.dot_dimension_numbers<[1], [0], [0], [1], [0, 0, 1, 1], [], []>} : vector<128x128xf32>, vector<128x256xf32>, vector<128x256xf32> -> vector<128x256xf32>
    %c0_12 = arith.constant 0 : index
    %c256_13 = arith.constant 256 : index
    %15 = vector.load %arg4[%c0_12, %c256_13] : memref<1x896xf32, #tpu.memory_space<vmem>>, vector<1x256xf32>
    %16 = vector.broadcast %15 : vector<1x256xf32> to vector<128x256xf32>
    %17 = arith.addf %14, %16 : vector<128x256xf32>
    %18 = vector.extract_strided_slice %17 {offsets = [0, 0], sizes = [128, 128], strides = [1, 1]} : vector<128x256xf32> to vector<128x128xf32>
    %19 = vector.extract_strided_slice %17 {offsets = [0, 128], sizes = [128, 128], strides = [1, 1]} : vector<128x256xf32> to vector<128x128xf32>
    %c0_14 = arith.constant 0 : index
    %c0_15 = arith.constant 0 : index
    %20 = vector.load %arg2[%c0_14, %c0_15] : memref<128x128xf32, #tpu.memory_space<vmem>>, vector<128x128xf32>
    %cst_16 = arith.constant 5.000000e-01 : f32
    %21 = vector.broadcast %cst_16 : f32 to vector<128x128xf32>
    %22 = arith.mulf %21, %19 : vector<128x128xf32>
    %23 = math.exp %22 : vector<128x128xf32>
    %24 = arith.mulf %20, %23 : vector<128x128xf32>
    %25 = arith.addf %24, %18 : vector<128x128xf32>
    %c0_17 = arith.constant 0 : index
    %c512 = arith.constant 512 : index
    %26 = vector.load %arg3[%c0_17, %c512] : memref<128x896xf32, #tpu.memory_space<vmem>>, vector<128x128xf32>
    %cst_18 = arith.constant dense<0.000000e+00> : vector<128x128xf32>
    %27 = tpu.matmul %25, %26, %cst_18 {dimension_numbers = #tpu.dot_dimension_numbers<[1], [0], [0], [1], [0, 0, 1, 1], [], []>} : vector<128x128xf32>, vector<128x128xf32>, vector<128x128xf32> -> vector<128x128xf32>
    %c0_19 = arith.constant 0 : index
    %c512_20 = arith.constant 512 : index
    %28 = vector.load %arg4[%c0_19, %c512_20] : memref<1x896xf32, #tpu.memory_space<vmem>>, vector<1x128xf32>
    %29 = vector.broadcast %28 : vector<1x128xf32> to vector<128x128xf32>
    %30 = arith.addf %27, %29 : vector<128x128xf32>
    %cst_21 = arith.constant 0.000000e+00 : f32
    %31 = vector.broadcast %cst_21 : f32 to vector<128x128xf32>
    %32 = arith.maximumf %30, %31 : vector<128x128xf32>
    %c0_22 = arith.constant 0 : index
    %c640 = arith.constant 640 : index
    %33 = vector.load %arg3[%c0_22, %c640] : memref<128x896xf32, #tpu.memory_space<vmem>>, vector<128x128xf32>
    %cst_23 = arith.constant dense<0.000000e+00> : vector<128x128xf32>
    %34 = tpu.matmul %32, %33, %cst_23 {dimension_numbers = #tpu.dot_dimension_numbers<[1], [0], [0], [1], [0, 0, 1, 1], [], []>} : vector<128x128xf32>, vector<128x128xf32>, vector<128x128xf32> -> vector<128x128xf32>
    %c0_24 = arith.constant 0 : index
    %c640_25 = arith.constant 640 : index
    %35 = vector.load %arg4[%c0_24, %c640_25] : memref<1x896xf32, #tpu.memory_space<vmem>>, vector<1x128xf32>
    %36 = vector.broadcast %35 : vector<1x128xf32> to vector<128x128xf32>
    %37 = arith.addf %34, %36 : vector<128x128xf32>
    %cst_26 = arith.constant 0.000000e+00 : f32
    %38 = vector.broadcast %cst_26 : f32 to vector<128x128xf32>
    %39 = arith.maximumf %37, %38 : vector<128x128xf32>
    %c0_27 = arith.constant 0 : index
    %c768 = arith.constant 768 : index
    %40 = vector.load %arg3[%c0_27, %c768] : memref<128x896xf32, #tpu.memory_space<vmem>>, vector<128x128xf32>
    %cst_28 = arith.constant dense<0.000000e+00> : vector<128x128xf32>
    %41 = tpu.matmul %39, %40, %cst_28 {dimension_numbers = #tpu.dot_dimension_numbers<[1], [0], [0], [1], [0, 0, 1, 1], [], []>} : vector<128x128xf32>, vector<128x128xf32>, vector<128x128xf32> -> vector<128x128xf32>
    %c0_29 = arith.constant 0 : index
    %c768_30 = arith.constant 768 : index
    %42 = vector.load %arg4[%c0_29, %c768_30] : memref<1x896xf32, #tpu.memory_space<vmem>>, vector<1x128xf32>
    %43 = vector.broadcast %42 : vector<1x128xf32> to vector<128x128xf32>
    %44 = arith.addf %41, %43 : vector<128x128xf32>
    %c0_31 = arith.constant 0 : index
    %c0_32 = arith.constant 0 : index
    %45 = vector.load %arg5[%c0_31, %c0_32] : memref<128x384xf32, #tpu.memory_space<vmem>>, vector<128x128xf32>
    tpu.vector_store %arg5[%c0_31, %c0_32], %44 {strides = array<i32>} : memref<128x384xf32, #tpu.memory_space<vmem>>, vector<128x128xf32>,
    %c0_33 = arith.constant 0 : index
    %c128_34 = arith.constant 128 : index
    %46 = vector.load %arg5[%c0_33, %c128_34] : memref<128x384xf32, #tpu.memory_space<vmem>>, vector<128x128xf32>
    tpu.vector_store %arg5[%c0_33, %c128_34], %18 {strides = array<i32>} : memref<128x384xf32, #tpu.memory_space<vmem>>, vector<128x128xf32>,
    %c0_35 = arith.constant 0 : index
    %c256_36 = arith.constant 256 : index
    %47 = vector.load %arg5[%c0_35, %c256_36] : memref<128x384xf32, #tpu.memory_space<vmem>>, vector<128x128xf32>
    tpu.vector_store %arg5[%c0_35, %c256_36], %19 {strides = array<i32>} : memref<128x384xf32, #tpu.memory_space<vmem>>, vector<128x128xf32>,
    return
  }
  func.func @transform_0(%arg0: i32) -> (i32, i32) {
    %c0_i32 = arith.constant 0 : i32
    %c0_i32_0 = arith.constant 0 : i32
    return %arg0, %c0_i32 : i32, i32
  }
  func.func @transform_1(%arg0: i32) -> (i32, i32) {
    %c0_i32 = arith.constant 0 : i32
    %c0_i32_0 = arith.constant 0 : i32
    return %arg0, %c0_i32 : i32, i32
  }
  func.func @transform_2(%arg0: i32) -> (i32, i32) {
    %c0_i32 = arith.constant 0 : i32
    %c0_i32_0 = arith.constant 0 : i32
    %c0_i32_1 = arith.constant 0 : i32
    return %c0_i32, %c0_i32_0 : i32, i32
  }
  func.func @transform_3(%arg0: i32) -> (i32, i32) {
    %c0_i32 = arith.constant 0 : i32
    %c0_i32_0 = arith.constant 0 : i32
    %c0_i32_1 = arith.constant 0 : i32
    return %c0_i32, %c0_i32_0 : i32, i32
  }
  func.func @transform_4(%arg0: i32) -> (i32, i32) {
    %c0_i32 = arith.constant 0 : i32
    %c0_i32_0 = arith.constant 0 : i32
    return %arg0, %c0_i32 : i32, i32
  }
}

</mosaic_0001>

<bundles_post_ra>
// kernel: tpu_custom_call.1
= control target key start
LH: loop header
LB: loop body
LE: loop exit
PB: predicated region body
PF: predicated region fallthrough
CT: control target
= control target key end

     0   :  { %s3101_s0 = inlined_call_operand.hbm [shape: f32[256,128], index: 0, kind: input, shape index: {}]   ;;  %s3102_s1 = inlined_call_operand.hbm [shape: f32[256,128], index: 1, kind: input, shape index: {}]   ;;  %s3103_s2 = inlined_call_operand.hbm [shape: f32[128,896], index: 2, kind: input, shape index: {}]   ;;  %s3104_s3 = inlined_call_operand.vmem [shape: f32[1,896], index: 3, kind: input, shape index: {}]   ;;  %s3105_s4 = inlined_call_operand.hbm [shape: f32[256,384], index: 4, kind: output, shape index: {}]  }
   0x1   :  { %3109 = sst [smem:[#allocation13_spill]] %s3101_s0 }
   0x2   :  { %9 = vsyncpa [#allocation3], 0 }
   0x3   :  { %11 = vsyncpa [#allocation3 + $0x1], 0 }
   0x4   :  { %12 = vsyncpa [#allocation6], 0 }
   0x5   :  { %14 = vsyncpa [#allocation6 + $0x1], 0 }
   0x6   :  { %15 = vsyncpa [#allocation4], 0 }
   0x7   :  { %17 = vsyncpa [#allocation4 + $0x1], 0  ;;  %s2623_s15 = smov 0   ;;  %s2625_s16 = smov 0  }
   0x8   :  { %s2627_s17 = smov 0   ;;  %s2629_s18 = smov 0  }
   0x9 LB: > { %s2644_s19 = sadd.s32 4294967295, %s2585_s18   ;;  %s1646_s20 = sadd.s32 4294967294, %s2585_s18   ;;  %s2585_s18 = sphi %s2629_s18, %s3127_s18   ;;  %s2581_s17 = sphi %s2627_s17, %s3126_s17   ;;  %s2577_s16 = sphi %s2625_s16, %s3125_s16   ;;  %s2573_s15 = sphi %s2623_s15, %s3124_s15  }
   0xa   : > { %p43_p0 = scmp.ne.s32.totalorder %s2577_s16, %s2573_s15  ;;  %p3106_p1 = scmp.eq.s32.totalorder %s2644_s19, 0 }
   0xb   : > { %p141_p3 = scmp.eq.s32.totalorder %s1646_s20, 1  ;;  %p1647_p5 = scmp.ge.s32.totalorder %s2585_s18, 1 }
   0xc   : > { %p2653_p4 = por %p3106_p1, %p43_p0  ;;  %p148_p7 = scmp.lt.s32.totalorder %s2585_s18, 3 }
   0xd   : > { %p2658_p6 = por %p141_p3, %p43_p0  ;;  %s2587_s24 = smov [#allocation7]  }
   0xe   : > { %s3110_s21 = scalar_select %p2653_p4, 1, 0 }
   0xf   : > { %s3111_s22 = scalar_select %p2658_p6, 1, 0 }
  0x10   : > { %p2663_p8 = pnand %p1647_p5, %p148_p7  ;;  %s160_s25 = sshll.u32 %s2587_s24, 4  ;;  %s2667_s25 = int_to_ptr.vmem [resolvable:$true] %s160_s25 }
  0x11   : > { %s2679_s27 = sadd.s32 1, %s2585_s18   ;;  %s30_s28 = sadd.s32 1, %s2581_s17 }
  0x12   : > { %s3112_s23 = scalar_select %p2663_p8, 1, 0 }
  0x13   : > { %p2332_p9 = pneg %p2663_p8  ;;  %s27_s29 = ssub.s32 %s2585_s18, %s2679_s27 }
  0x14   : > { %s2423_s6 = scalar_lea.hbm %s3103_s2, 14336 }
  0x15   : > { %p2674_p11 = pnand %p2332_p9, %p3106_p1  ;;  %p2424_p12 = scmp.ne.s32.totalorder %s3103_s2, %s2423_s6 }
  0x16   : > { %p2430_p5 = scmp.lt.u32.totalorder %s2423_s6, %s3103_s2 }
  0x17   : > { %p2425_p13 = pneg %p2674_p11 }
  0x19   : > { %p2426_p0 = pnand %p2425_p13, %p2424_p12 }
  0x1b   : > { %p2427_p3 = pneg %p2426_p0 }
  0x1d   : > { %p2432_p7 = pnand %p2430_p5, %p2427_p3 }
  0x1f   : > { %2435 = shalt.err (!%p2432_p7)
}
  0x20   : > { %s2436_s11 = scalar_lea.vmem %s2667_s25, 14336  ;;  %p2444_p2 = scmp.lt.s32.totalorder %s2667_s25, %s2667_s25 }
  0x21   : > { %p2437_p9 = scmp.ne.s32.totalorder %s2667_s25, %s2436_s11  ;;  %p2445_p6 = scmp.lt.s32.totalorder %s2436_s11, %s2436_s11 }
  0x23   : > { %p2439_p10 = pnand %p2437_p9, %p2425_p13  ;;  %p2446_p4 = por %p2445_p6, %p2444_p2 }
  0x25   : > { %p2440_p1 = pneg %p2439_p10 }
  0x27   : > { %p2447_p8 = pnand %p2446_p4, %p2440_p1 }
  0x29   : > { %2450 = shalt.err (!%p2447_p8)
}
  0x2a   : > { %s2588_s12 = smov 896   ;;  %s2589_s13 = smov 56  }
  0x2b   : > { %2335 = dma.hbm_to_vmem [thread:$0]  (!%p2674_p11), %s3103_s2, 14336, %s2667_s25, [#allocation6], %s2588_s12, %s2588_s12, %s2589_s13  }
  0x2c   : > { %p28_p1 = scmp.eq.s32.totalorder %s27_s29, 0  ;;  %p37_p2 = scmp.ne.s32.totalorder %s2581_s17, %s2577_s16 }
  0x2d   : > { %p38_p4 = scmp.eq.s32.totalorder %s2585_s18, 0  ;;  %p2348_p6 = scmp.lt.s32.totalorder %s2585_s18, 2 }
  0x2e   : > { %s2710_s24 = scalar_select %p28_p1, %s2581_s17, %s30_s28  }
  0x2f   : > { %p39_p8 = por %p38_p4, %p37_p2  ;;  %p3114_p10 = scmp.eq.s32.totalorder %s2644_s19, 1 }
  0x30   : > { %s177_s5 = sand.u32 1, %s2581_s17   ;;  %s1670_s6 = sshll.u32 %s2585_s18, 11 }
  0x31   : > { %p2714_p12 = por %p3114_p10, %p37_p2  ;;  %s2720_s7 = sshll.u32 %s177_s5, 7 }
  0x32   : > { %s3116_s0 = sld [smem:[#allocation13_spill]]  ;;  %s181_s28 = scalar_lea.vmem [#allocation2], %s2720_s7 }
  0x33   : > { %s188_s29 = sshll.u32 %s181_s28, 4  ;;  %p2730_p11 = pnand %p2348_p6, %p39_p8  ;;  %s2734_s29 = int_to_ptr.vmem [resolvable:$true] %s188_s29 }
  0x34   : > { %s2736_s10 = scalar_lea.sflag [#allocation3], %s177_s5 }
  0x35   : > { %p2453_p0 = pneg %p2730_p11 }
  0x38   : > { %s2727_s25 = scalar_lea.hbm %s3116_s0, %s1670_s6  ;;  %s2456_s14 = scalar_lea.hbm %s3116_s0, 4096 }
  0x39   : > { %s2451_s11 = scalar_lea.hbm %s2727_s25, 2048  ;;  %p2457_p7 = scmp.lt.u32.totalorder %s2727_s25, %s3116_s0 }
  0x3a   : > { %p2452_p13 = scmp.ne.s32.totalorder %s2727_s25, %s2451_s11  ;;  %p2458_p9 = scmp.lt.u32.totalorder %s2456_s14, %s2451_s11 }
  0x3b   : > { %p2460_p2 = scmp.lt.u32.totalorder %s2451_s11, %s2727_s25 }
  0x3c   : > { %p2454_p3 = pnand %p2453_p0, %p2452_p13  ;;  %p2459_p1 = por %p2458_p9, %p2457_p7 }
  0x3e   : > { %p2455_p5 = pneg %p2454_p3  ;;  %p2461_p4 = por %p2460_p2, %p2459_p1 }
  0x40   : > { %p2462_p6 = pnand %p2461_p4, %p2455_p5 }
  0x42   : > { %2465 = shalt.err (!%p2462_p6)
}
  0x43   : > { %s2466_s5 = scalar_lea.vmem %s2734_s29, 2048  ;;  %s2590_s8 = smov [#allocation2]  }
  0x44   : > { %p2467_p8 = scmp.ne.s32.totalorder %s2734_s29, %s2466_s5  ;;  %s2471_s28 = sshll.u32 %s2590_s8, 4  ;;  %s2472_s28 = int_to_ptr.vmem [resolvable:$false] %s2471_s28 }
  0x45   : > { %s2473_s12 = scalar_lea.vmem %s2472_s28, 4096  ;;  %p2474_p3 = scmp.lt.s32.totalorder %s2734_s29, %s2472_s28 }
  0x46   : > { %p2469_p10 = pnand %p2467_p8, %p2453_p0  ;;  %p2475_p7 = scmp.lt.s32.totalorder %s2473_s12, %s2466_s5 }
  0x48   : > { %p2470_p13 = pneg %p2469_p10  ;;  %p2476_p9 = por %p2475_p7, %p2474_p3 }
  0x4a   : > { %p2477_p1 = pnand %p2476_p9, %p2470_p13 }
  0x4c   : > { %2480 = shalt.err (!%p2477_p1)
}
  0x4d   : > { %s2591_s11 = smov 128   ;;  %s2592_s13 = smov 8  }
  0x4e   : > { %2339 = dma.hbm_to_vmem [thread:$0]  (!%p2730_p11), %s2727_s25, 2048, %s2734_s29, %s2736_s10, %s2591_s11, %s2591_s11, %s2592_s13  }
  0x4f   : > { %s2772_s26 = scalar_lea.hbm %s3102_s1, %s1670_s6  ;;  %s202_s5 = scalar_lea.vmem [#allocation5], %s2720_s7 }
  0x50   : > { %s209_s8 = sshll.u32 %s202_s5, 4  ;;  %s198_s28 = sand.u32 1, %s2585_s18   ;;  %s2776_s8 = int_to_ptr.vmem [resolvable:$true] %s209_s8 }
  0x51   : > { %s2778_s12 = scalar_lea.sflag [#allocation6], %s198_s28  ;;  %s2481_s0 = scalar_lea.hbm %s2772_s26, 2048 }
  0x52   : > { %p2482_p5 = scmp.ne.s32.totalorder %s2772_s26, %s2481_s0  ;;  %s2486_s29 = scalar_lea.hbm %s3102_s1, 4096 }
  0x53   : > { %p2487_p6 = scmp.lt.u32.totalorder %s2772_s26, %s3102_s1  ;;  %p2488_p8 = scmp.lt.u32.totalorder %s2486_s29, %s2481_s0 }
  0x54   : > { %p2484_p2 = pnand %p2482_p5, %p2453_p0  ;;  %p2490_p13 = scmp.lt.u32.totalorder %s2481_s0, %s2772_s26 }
  0x55   : > { %p2489_p10 = por %p2488_p8, %p2487_p6 }
  0x56   : > { %p2485_p4 = pneg %p2484_p2 }
  0x57   : > { %p2491_p3 = por %p2490_p13, %p2489_p10 }
  0x59   : > { %p2492_p7 = pnand %p2491_p3, %p2485_p4 }
  0x5b   : > { %2495 = shalt.err (!%p2492_p7)
}
  0x5c   : > { %s2496_s7 = scalar_lea.vmem %s2776_s8, 2048  ;;  %s2593_s20 = smov [#allocation5]  }
  0x5d   : > { %p2497_p9 = scmp.ne.s32.totalorder %s2776_s8, %s2496_s7  ;;  %s2501_s5 = sshll.u32 %s2593_s20, 4  ;;  %s2502_s5 = int_to_ptr.vmem [resolvable:$false] %s2501_s5 }
  0x5e   : > { %s2503_s28 = scalar_lea.vmem %s2502_s5, 4096  ;;  %p2504_p2 = scmp.lt.s32.totalorder %s2776_s8, %s2502_s5 }
  0x5f   : > { %p2499_p1 = pnand %p2497_p9, %p2453_p0  ;;  %p2505_p6 = scmp.lt.s32.totalorder %s2503_s28, %s2496_s7 }
  0x61   : > { %p2500_p5 = pneg %p2499_p1  ;;  %p2506_p8 = por %p2505_p6, %p2504_p2 }
  0x63   : > { %p2507_p10 = pnand %p2506_p8, %p2500_p5 }
  0x65   : > { %2510 = shalt.err (!%p2507_p10)
}
  0x66   : > { %2342 = dma.hbm_to_vmem [thread:$0]  (!%p2730_p11), %s2772_s26, 2048, %s2776_s8, %s2778_s12, %s2591_s11, %s2591_s11, %s2592_s13  }
  0x67   : > { %p3118_p0 = scmp.ne.s32.totalorder %s3112_s23, 0 }
  0x68   : > { %s2810_s0 = sand.u32 (!%p3118_p0), 1, %s2577_s16   ;;  %p3119_p4 = scmp.ne.s32.totalorder (!%p3118_p0), %s3110_s21, 0 }
  0x69   : > { %221 = sbr.rel (%p3118_p0) target bundleno = 1547 (0x60b), region = 36  ;;  %s1657_s25 = sshll.u32 (!%p3118_p0), %s2810_s0, 7 }
  0x6a   : > { %s224_s6 = scalar_lea.sflag (!%p3118_p0), [#allocation3], %s2810_s0  ;;  %s2814_s29 = scalar_lea.vmem (!%p3118_p0), [#allocation2], %s1657_s25 }
  0x70   : > { %2556 = dma.done.wait (%p3119_p4), %s224_s6, 2048  }
  0x71   : > { %2558 = vsyncadd (%p3119_p4), %s224_s6, 4294965248  ;;  %s232_s9 = sand.u32 1, %s2644_s19   ;;  %s2821_s11 = scalar_lea.vmem [#allocation5], %s1657_s25 }
  0x72   : > { %s233_s23 = scalar_lea.sflag [#allocation6], %s232_s9 }
  0x73   : > { %2560 = dma.done.wait (%p3119_p4), %s233_s23, 2048  }
  0x74   : > { %2562 = vsyncadd (%p3119_p4), %s233_s23, 4294965248  ;;  %p3120_p11 = scmp.eq.s32.totalorder %s2644_s19, 0 }
  0x76   : > { %2564 = dma.done.wait (%p3120_p11), [#allocation6], 14336   ;;  %p3121_p13 = pmov %p3120_p11 }
  0x77   : > { %v289_v0 = vld [vmem:[#allocation7] sm:$0xff]  ;;  %v290_v1 = vld [vmem:[#allocation7 + $0x38] sm:$0xff]  ;;  %v291_v2 = vld [vmem:[#allocation7 + $0x70] sm:$0xff]  ;;  %s2320_s14 = smul.u32 384, %s2810_s0  ;;  %s1527_s26 = scalar_lea.sflag [#allocation4], %s2810_s0 }
  0x78   : > { %2566 = vsyncadd (%p3121_p13), [#allocation6], 4294952960  ;;  %v2112_v3 = vpack.c.bf16 %v290_v1, %v289_v0  ;;  %v292_v4 = vld [vmem:[#allocation7 + $0xa8] sm:$0xff]  ;;  %v293_v6 = vld [vmem:[#allocation7 + $0xe0] sm:$0xff]  ;;  %s2321_s9 = smul.u32 6144, %s2644_s19  ;;  %s2595_s19 = smov [#allocation8]  }
  0x79   : > { %v2116_v5 = vpack.c.bf16 %v292_v4, %v291_v2  ;;  %v294_v7 = vld [vmem:[#allocation7 + $0x118] sm:$0xff]  ;;  %v273_v9 = vld [vmem:[%s2814_s29] sm:$0xff]  ;;  %v295_v10 = vld [vmem:[#allocation7 + $0x150] sm:$0xff]  ;;  %s2882_s7 = scalar_lea.vmem [#allocation8], %s2320_s14  ;;  %s2515_s12 = sshll.u32 %s2595_s19, 4  ;;  %s2516_s12 = int_to_ptr.vmem [resolvable:$false] %s2515_s12 }
  0x7a   : > { %2113 = vmatprep.subr.bf16.mxu0 %v2112_v3  ;;  %v2120_v8 = vpack.c.bf16 %v294_v7, %v293_v6  ;;  %v296_v11 = vld [vmem:[#allocation7 + $0x188] sm:$0xff]  ;;  %1864 = vmatprep.mubr.f32.mxu0 %v273_v9  ;;  %v297_v13 = vld [vmem:[#allocation7 + $0x1c0] sm:$0xff]  ;;  %v298_v14 = vld [vmem:[#allocation7 + $0x1f8] sm:$0xff]  ;;  %s1541_s23 = sshll.u32 %s2882_s7, 4  ;;  %s3053_s13 = scalar_lea.hbm %s3105_s4, %s2321_s9  ;;  %s3055_s23 = int_to_ptr.vmem [resolvable:$true] %s1541_s23 }
  0x7b   : > { %2115 = vmatpush3.bf16.msra.mxu0 %v2112_v3  ;;  %v2124_v12 = vpack.c.bf16 %v296_v11, %v295_v10  ;;  %v473_v15 = vld [vmem:[#allocation7 + $0x8] sm:$0xff]  ;;  %v474_v16 = vld [vmem:[#allocation7 + $0x40] sm:$0xff]  ;;  %v475_v17 = vld [vmem:[#allocation7 + $0x78] sm:$0xff]  ;;  %v2128_v21 = vpack.c.bf16 %v298_v14, %v297_v13  ;;  %s2511_s8 = scalar_lea.vmem %s3055_s23, 6144  ;;  %s2517_s10 = scalar_lea.vmem %s2516_s12, 12288 }
  0x7c   : > { %2117 = vmatprep.subr.bf16.mxu0 %v2116_v5  ;;  %v476_v18 = vld [vmem:[#allocation7 + $0xb0] sm:$0xff]  ;;  %v2144_v19 = vpack.c.bf16 %v474_v16, %v473_v15  ;;  %v477_v22 = vld [vmem:[#allocation7 + $0xe8] sm:$0xff]  ;;  %v478_v23 = vld [vmem:[#allocation7 + $0x120] sm:$0xff]  ;;  %p2512_p3 = scmp.ne.s32.totalorder %s3055_s23, %s2511_s8  ;;  %p2518_p1 = scmp.lt.s32.totalorder %s3055_s23, %s2516_s12 }
  0x7d   : > { %v2148_v20 = vpack.c.bf16 %v476_v18, %v475_v17  ;;  %v299_v24 = vld [vmem:[#allocation7 + $0x230] sm:$0xff]  ;;  %v300_v25 = vld [vmem:[#allocation7 + $0x268] sm:$0xff]  ;;  %v2152_v26 = vpack.c.bf16 %v478_v23, %v477_v22  ;;  %v479_v28 = vld [vmem:[#allocation7 + $0x158] sm:$0xff]  ;;  %p2519_p5 = scmp.lt.s32.totalorder %s2517_s10, %s2511_s8 }
  0x7e   : > { %2145 = vmatprep.subr.bf16.mxu1 %v2144_v19  ;;  %v2132_v27 = vpack.c.bf16 %v300_v25, %v299_v24  ;;  %v480_v29 = vld [vmem:[#allocation7 + $0x190] sm:$0xff]  ;;  %v301_v30 = vld [vmem:[#allocation7 + $0x2a0] sm:$0xff]  ;;  %v302_v31 = vld [vmem:[#allocation7 + $0x2d8] sm:$0xff]  ;;  %p2513_p7 = pnand %p2512_p3, %p2714_p12 }
  0x7f   : > { %2119 = vmatpush3.bf16.msra.mxu0 %v2116_v5  ;;  %2147 = vmatpush3.bf16.msra.mxu1 %v2144_v19  ;;  %v2156_v32 = vpack.c.bf16 %v480_v29, %v479_v28  ;;  %v2136_v33 = vpack.c.bf16 %v302_v31, %v301_v30  ;;  %v481_v34 = vld [vmem:[#allocation7 + $0x1c8] sm:$0xff]  ;;  %v482_v35 = vld [vmem:[#allocation7 + $0x200] sm:$0xff]  ;;  %v303_v36 = vld [vmem:[#allocation7 + $0x310] sm:$0xff]  ;;  %p2520_p2 = por %p2519_p5, %p2518_p1 }
  0x80   : > { %2121 = vmatprep.subr.bf16.mxu0 %v2120_v8  ;;  %2149 = vmatprep.subr.bf16.mxu1 %v2148_v20  ;;  %v304_v37 = vld [vmem:[#allocation7 + $0x348] sm:$0xff]  ;;  %v2160_v38 = vpack.c.bf16 %v482_v35, %v481_v34  ;;  %v483_v40 = vld [vmem:[#allocation7 + $0x238] sm:$0xff]  ;;  %v484_v41 = vld [vmem:[#allocation7 + $0x270] sm:$0xff]  ;;  %p2514_p9 = pneg %p2513_p7 }
  0x81   : > { %v2140_v39 = vpack.c.bf16 %v304_v37, %v303_v36  ;;  %v2164_v42 = vpack.c.bf16 %v484_v41, %v483_v40  ;;  %v485_v43 = vld [vmem:[#allocation7 + $0x2a8] sm:$0xff]  ;;  %v486_v44 = vld [vmem:[#allocation7 + $0x2e0] sm:$0xff]  ;;  %v275_v47 = vld [vmem:[%s2814_s29 + $0x10] sm:$0xff] }
  0x82   : > { %v274_v45 = vld [vmem:[%s2814_s29 + $0x8] sm:$0xff]  ;;  %v2168_v46 = vpack.c.bf16 %v486_v44, %v485_v43  ;;  %v276_v48 = vld [vmem:[%s2814_s29 + $0x18] sm:$0xff]  ;;  %v277_v49 = vld [vmem:[%s2814_s29 + $0x20] sm:$0xff]  ;;  %p2521_p6 = pnand %p2520_p2, %p2514_p9 }
  0x83   : > { %2123 = vmatpush3.bf16.msra.mxu0 %v2120_v8  ;;  %2151 = vmatpush3.bf16.msra.mxu1 %v2148_v20  ;;  %v278_v50 = vld [vmem:[%s2814_s29 + $0x28] sm:$0xff]  ;;  %v279_v51 = vld [vmem:[%s2814_s29 + $0x30] sm:$0xff]  ;;  %v280_v52 = vld [vmem:[%s2814_s29 + $0x38] sm:$0xff] }
  0x84   : > { %2125 = vmatprep.subr.bf16.mxu0 %v2124_v12  ;;  %2153 = vmatprep.subr.bf16.mxu1 %v2152_v26  ;;  %v281_v53 = vld [vmem:[%s2814_s29 + $0x40] sm:$0xff]  ;;  %v282_v54 = vld [vmem:[%s2814_s29 + $0x48] sm:$0xff]  ;;  %v283_v55 = vld [vmem:[%s2814_s29 + $0x50] sm:$0xff] }
  0x85   : > { %v284_v56 = vld [vmem:[%s2814_s29 + $0x58] sm:$0xff]  ;;  %v285_v57 = vld [vmem:[%s2814_s29 + $0x60] sm:$0xff]  ;;  %v286_v58 = vld [vmem:[%s2814_s29 + $0x68] sm:$0xff] }
  0x86   : > { %v287_v59 = vld [vmem:[%s2814_s29 + $0x70] sm:$0xff]  ;;  %v288_v60 = vld [vmem:[%s2814_s29 + $0x78] sm:$0xff]  ;;  %v643_v4 = vld [vmem:[#allocation7 + $0x48] sm:$0xff] }
  0x87   : > { %2127 = vmatpush3.bf16.msra.mxu0 %v2124_v12  ;;  %2155 = vmatpush3.bf16.msra.mxu1 %v2152_v26  ;;  %v487_v61 = vld [vmem:[#allocation7 + $0x318] sm:$0xff]  ;;  %v488_v62 = vld [vmem:[#allocation7 + $0x350] sm:$0xff]  ;;  %v646_v5 = vld [vmem:[#allocation7 + $0x88] sm:$0xff] }
  0x88   : > { %2129 = vmatprep.subr.bf16.mxu0 %v2128_v21  ;;  %2157 = vmatprep.subr.bf16.mxu1 %v2156_v32  ;;  %v2172_v63 = vpack.c.bf16 %v488_v62, %v487_v61  ;;  %v642_v0 = vld [vmem:[#allocation7 + $0x18] sm:$0xff]  ;;  %v644_v1 = vld [vmem:[#allocation7 + $0x50] sm:$0xff]  ;;  %v648_v6 = vld [vmem:[#allocation7 + $0xc0] sm:$0xff] }
  0x89   : > { %v641_v2 = vld [vmem:[#allocation7 + $0x10] sm:$0xff]  ;;  %v2176_v3 = vpack.c.bf16 %v644_v1, %v642_v0  ;;  %v2180_v8 = vpack.c.bf16 %v648_v6, %v646_v5  ;;  %v645_v9 = vld [vmem:[#allocation7 + $0x80] sm:$0xff]  ;;  %v647_v10 = vld [vmem:[#allocation7 + $0xb8] sm:$0xff] }
  0x8a   : > { %v2178_v7 = vpack.c.bf16 %v643_v4, %v641_v2  ;;  %v650_v11 = vld [vmem:[#allocation7 + $0xf8] sm:$0xff]  ;;  %v652_v12 = vld [vmem:[#allocation7 + $0x130] sm:$0xff]  ;;  %v2182_v13 = vpack.c.bf16 %v647_v10, %v645_v9  ;;  %v651_v16 = vld [vmem:[#allocation7 + $0x128] sm:$0xff] }
  0x8b   : > { %2131 = vmatpush3.bf16.msra.mxu0 %v2128_v21  ;;  %2159 = vmatpush3.bf16.msra.mxu1 %v2156_v32  ;;  %v2184_v14 = vpack.c.bf16 %v652_v12, %v650_v11  ;;  %v649_v15 = vld [vmem:[#allocation7 + $0xf0] sm:$0xff]  ;;  %v654_v17 = vld [vmem:[#allocation7 + $0x168] sm:$0xff]  ;;  %v656_v18 = vld [vmem:[#allocation7 + $0x1a0] sm:$0xff] }
  0x8c   : > { %2133 = vmatprep.subr.bf16.mxu0 %v2132_v27  ;;  %2161 = vmatprep.subr.bf16.mxu1 %v2160_v38  ;;  %v2186_v19 = vpack.c.bf16 %v651_v16, %v649_v15  ;;  %v2188_v20 = vpack.c.bf16 %v656_v18, %v654_v17  ;;  %v653_v21 = vld [vmem:[#allocation7 + $0x160] sm:$0xff]  ;;  %v655_v22 = vld [vmem:[#allocation7 + $0x198] sm:$0xff]  ;;  %v660_v24 = vld [vmem:[#allocation7 + $0x210] sm:$0xff] }
  0x8d   : > { %v658_v23 = vld [vmem:[#allocation7 + $0x1d8] sm:$0xff]  ;;  %v2190_v25 = vpack.c.bf16 %v655_v22, %v653_v21  ;;  %v659_v28 = vld [vmem:[#allocation7 + $0x208] sm:$0xff]  ;;  %v664_v30 = vld [vmem:[#allocation7 + $0x280] sm:$0xff] }
  0x8e   : > { %v2192_v26 = vpack.c.bf16 %v660_v24, %v658_v23  ;;  %v662_v29 = vld [vmem:[#allocation7 + $0x248] sm:$0xff]  ;;  %v663_v34 = vld [vmem:[#allocation7 + $0x278] sm:$0xff]  ;;  %v668_v36 = vld [vmem:[#allocation7 + $0x2f0] sm:$0xff] }
  0x8f   : > { %2135 = vmatpush3.bf16.msra.mxu0 %v2132_v27  ;;  %2163 = vmatpush3.bf16.msra.mxu1 %v2160_v38  ;;  %v657_v27 = vld [vmem:[#allocation7 + $0x1d0] sm:$0xff]  ;;  %v2196_v32 = vpack.c.bf16 %v664_v30, %v662_v29  ;;  %v666_v35 = vld [vmem:[#allocation7 + $0x2b8] sm:$0xff]  ;;  %v667_v40 = vld [vmem:[#allocation7 + $0x2e8] sm:$0xff] }
  0x90   : > { %2137 = vmatprep.subr.bf16.mxu0 %v2136_v33  ;;  %2165 = vmatprep.subr.bf16.mxu1 %v2164_v42  ;;  %v2194_v31 = vpack.c.bf16 %v659_v28, %v657_v27  ;;  %v2200_v38 = vpack.c.bf16 %v668_v36, %v666_v35  ;;  %v670_v41 = vld [vmem:[#allocation7 + $0x328] sm:$0xff]  ;;  %v669_v30 = vld [vmem:[#allocation7 + $0x320] sm:$0xff]  ;;  %v943_v35 = vld [vmem:[#allocation7 + $0x58] sm:$0xff] }
  0x91   : > { %v944_v36 = vld [vmem:[#allocation7 + $0x90] sm:$0xff] }
  0x93   : > { %2139 = vmatpush3.bf16.msra.mxu0 %v2136_v33  ;;  %2167 = vmatpush3.bf16.msra.mxu1 %v2164_v42  ;;  %v661_v33 = vld [vmem:[#allocation7 + $0x240] sm:$0xff] }
  0x94   : > { %2141 = vmatprep.subr.bf16.mxu0 %v2140_v39  ;;  %2169 = vmatprep.subr.bf16.mxu1 %v2168_v46  ;;  %v2198_v37 = vpack.c.bf16 %v663_v34, %v661_v33  ;;  %v672_v42 = vld [vmem:[#allocation7 + $0x360] sm:$0xff]  ;;  %v2594_v33 = vmov 0.0  }
  0x95   : > { %v2204_v44 = vpack.c.bf16 %v672_v42, %v670_v41  ;;  %v942_v34 = vld [vmem:[#allocation7 + $0x20] sm:$0xff] }
  0x97   : > { %2143 = vmatpush3.bf16.msra.mxu0 %v2140_v39  ;;  %2171 = vmatpush3.bf16.msra.mxu1 %v2168_v46  ;;  %v665_v39 = vld [vmem:[#allocation7 + $0x2b0] sm:$0xff] }
  0x98   : > { %2173 = vmatprep.subr.bf16.mxu1 %v2172_v63  ;;  %2177 = vmatprep.subr.bf16.mxu0 %v2176_v3  ;;  %v2202_v43 = vpack.c.bf16 %v667_v40, %v665_v39  ;;  %v1661_v40 = vld [vmem:[%s3104_s3 + $0x1] ss:$0 sm:$0xff] }
  0x9a   : > { %1865 = vmatmul.mubr.f32.vlgmr.msra.gmra.mrb[0].mxu0 %v274_v45  ;;  %v1660_v45 = vld [vmem:[%s3104_s3] ss:$0 sm:$0xff] }
  0x9b   : > { %1867 = vmatprep.mubr.f32.mxu0 %v275_v47  ;;  %2175 = vmatpush3.bf16.msra.mxu1 %v2172_v63 }
  0x9c   : > { %2179 = vmatpush1.bf16.msra.mxu0 %v2178_v7 }
  0x9d   : > { %2181 = vmatprep.subr.bf16.mxu0 %v2180_v8 }
  0x9e   : > { %1868 = vmatmul.mubr.f32.gmra.mrb[2].mxu0 %v276_v48 }
  0x9f   : > { %1870 = vmatprep.mubr.f32.mxu0 %v277_v49 }
  0xa0   : > { %2183 = vmatpush1.bf16.msra.mxu0 %v2182_v13 }
  0xa1   : > { %2185 = vmatprep.subr.bf16.mxu0 %v2184_v14 }
  0xa2   : > { %1871 = vmatmul.mubr.f32.gmra.mrb[4].mxu0 %v278_v50 }
  0xa3   : > { %1873 = vmatprep.mubr.f32.mxu0 %v279_v51 }
  0xa4   : > { %2187 = vmatpush1.bf16.msra.mxu0 %v2186_v19 }
  0xa5   : > { %2189 = vmatprep.subr.bf16.mxu0 %v2188_v20 }
  0xa6   : > { %1874 = vmatmul.mubr.f32.gmra.mrb[6].mxu0 %v280_v52 }
  0xa7   : > { %1876 = vmatprep.mubr.f32.mxu0 %v281_v53 }
  0xa8   : > { %2191 = vmatpush1.bf16.msra.mxu0 %v2190_v25 }
  0xa9   : > { %2193 = vmatprep.subr.bf16.mxu0 %v2192_v26 }
  0xaa   : > { %1877 = vmatmul.mubr.f32.gmra.mrb[8].mxu0 %v282_v54 }
  0xab   : > { %1879 = vmatprep.mubr.f32.mxu0 %v283_v55 }
  0xac   : > { %2195 = vmatpush1.bf16.msra.mxu0 %v2194_v31  ;;  %v671_v31 = vld [vmem:[#allocation7 + $0x358] sm:$0xff] }
  0xad   : > { %2197 = vmatprep.subr.bf16.mxu0 %v2196_v32  ;;  %v2206_v32 = vpack.c.bf16 %v671_v31, %v669_v30  ;;  %v675_v30 = vlaneseq }
  0xae   : > { %1880 = vmatmul.mubr.f32.gmra.mrb[10].mxu0 %v284_v56 }
  0xaf   : > { %1882 = vmatprep.mubr.f32.mxu0 %v285_v57  ;;  %v676_v31 = vshrl.u32 %v675_v30, 7 }
  0xb0   : > { %2199 = vmatpush1.bf16.msra.mxu0 %v2198_v37  ;;  %v2208_v37 = vpack.c.bf16 %v943_v35, %v942_v34 }
  0xb1   : > { %2201 = vmatprep.subr.bf16.mxu0 %v2200_v38  ;;  %v945_v38 = vld [vmem:[#allocation7 + $0xc8] sm:$0xff]  ;;  %v681_v34 = vsub.s32 1, %v676_v31 }
  0xb2   : > { %1883 = vmatmul.mubr.f32.gmra.mrb[12].mxu0 %v286_v58  ;;  %v2212_v39 = vpack.c.bf16 %v945_v38, %v944_v36  ;;  %2209 = vmatprep.subr.bf16.mxu1 %v2208_v37 }
  0xb3   : > { %1885 = vmatprep.mubr.f32.mxu0 %v287_v59 }
  0xb4   : > { %2203 = vmatpush1.bf16.msra.mxu0 %v2202_v43 }
  0xb5   : > { %2205 = vmatprep.subr.bf16.mxu0 %v2204_v44 }
  0xb6   : > { %1886 = vmatmul.mubr.f32.gmra.mrb[14].mxu0 %v288_v60 }
  0xb7   : > { %749 = vmatprep.mubr.f32.mxu0 %v2594_v33 }
  0xb8   : > { %2207 = vmatpush1.bf16.msra.mxu0 %v2206_v32  ;;  %v677_v32 = vsub.s32 0, %v676_v31 }
 0x16d   : > { %v1866_v46 = vpop.f32.mrb[0].mxu0 }
 0x16e   : > { %v384_v47 = vadd.f32 %v1866_v46, %v1660_v45  ;;  %v378_v48 = vpop.f32.mrb[1].mxu0 }
 0x16f   : > { %v379_v49 = vadd.f32 %v1660_v45, %v378_v48 }
 0x170   : > { %v458_v52 = vmax.f32 %v384_v47, 0.0 }
 0x171   : > { %v1869_v50 = vpop.f32.mrb[2].mxu0  ;;  %v457_v51 = vmax.f32 %v379_v49, 0.0 }
 0x172   : > { %v394_v53 = vadd.f32 %v1869_v50, %v1660_v45  ;;  %v388_v54 = vpop.f32.mrb[3].mxu0 }
 0x173   : > { %v389_v55 = vadd.f32 %v1660_v45, %v388_v54  ;;  %1920 = vmatprep.mubr.f32.mxu1 %v457_v51 }
 0x174   : > { %v460_v56 = vmax.f32 %v394_v53, 0.0  ;;  %1921 = vmatmul.mubr.f32.vlgmr.msra.gmra.mrb[0].mxu1 %v458_v52 }
 0x175   : > { %v459_v57 = vmax.f32 %v389_v55, 0.0  ;;  %v1872_v58 = vpop.f32.mrb[4].mxu0  ;;  %2211 = vmatpush3.bf16.msra.mxu1 %v2208_v37 }
 0x176   : > { %v404_v59 = vadd.f32 %v1872_v58, %v1660_v45  ;;  %v398_v60 = vpop.f32.mrb[5].mxu0  ;;  %2213 = vmatprep.subr.bf16.mxu1 %v2212_v39 }
 0x177   : > { %1923 = vmatprep.mubr.f32.mxu1 %v459_v57  ;;  %v399_v61 = vadd.f32 %v1660_v45, %v398_v60 }
 0x178   : > { %1924 = vmatmul.mubr.f32.gmra.mrb[2].mxu1 %v460_v56  ;;  %v462_v62 = vmax.f32 %v404_v59, 0.0 }
 0x179   : > { %v461_v63 = vmax.f32 %v399_v61, 0.0  ;;  %v1875_v0 = vpop.f32.mrb[6].mxu0  ;;  %2215 = vmatpush3.bf16.msra.mxu1 %v2212_v39 }
 0x17a   : > { %v414_v1 = vadd.f32 %v1875_v0, %v1660_v45  ;;  %v408_v2 = vpop.f32.mrb[7].mxu0 }
 0x17b   : > { %1926 = vmatprep.mubr.f32.mxu1 %v461_v63  ;;  %v409_v3 = vadd.f32 %v1660_v45, %v408_v2 }
 0x17c   : > { %1927 = vmatmul.mubr.f32.gmra.mrb[4].mxu1 %v462_v62  ;;  %v464_v4 = vmax.f32 %v414_v1, 0.0 }
 0x17d   : > { %v463_v5 = vmax.f32 %v409_v3, 0.0  ;;  %v1878_v6 = vpop.f32.mrb[8].mxu0 }
 0x17e   : > { %v424_v7 = vadd.f32 %v1878_v6, %v1660_v45  ;;  %v418_v8 = vpop.f32.mrb[9].mxu0 }
 0x17f   : > { %1929 = vmatprep.mubr.f32.mxu1 %v463_v5  ;;  %v419_v9 = vadd.f32 %v1660_v45, %v418_v8 }
 0x180   : > { %1930 = vmatmul.mubr.f32.gmra.mrb[6].mxu1 %v464_v4  ;;  %v466_v10 = vmax.f32 %v424_v7, 0.0 }
 0x181   : > { %v465_v11 = vmax.f32 %v419_v9, 0.0  ;;  %v1881_v12 = vpop.f32.mrb[10].mxu0  ;;  %v946_v9 = vld [vmem:[#allocation7 + $0x100] sm:$0xff] }
 0x182   : > { %v434_v13 = vadd.f32 %v1881_v12, %v1660_v45  ;;  %v428_v14 = vpop.f32.mrb[11].mxu0  ;;  %v948_v12 = vld [vmem:[#allocation7 + $0x170] sm:$0xff] }
 0x183   : > { %1932 = vmatprep.mubr.f32.mxu1 %v465_v11  ;;  %v429_v15 = vadd.f32 %v1660_v45, %v428_v14 }
 0x184   : > { %1933 = vmatmul.mubr.f32.gmra.mrb[8].mxu1 %v466_v10  ;;  %v468_v16 = vmax.f32 %v434_v13, 0.0  ;;  %v947_v10 = vld [vmem:[#allocation7 + $0x138] sm:$0xff]  ;;  %v949_v13 = vld [vmem:[#allocation7 + $0x1a8] sm:$0xff] }
 0x185   : > { %v467_v17 = vmax.f32 %v429_v15, 0.0  ;;  %v1884_v18 = vpop.f32.mrb[12].mxu0  ;;  %v2216_v11 = vpack.c.bf16 %v947_v10, %v946_v9  ;;  %v2220_v14 = vpack.c.bf16 %v949_v13, %v948_v12  ;;  %v950_v15 = vld [vmem:[#allocation7 + $0x1e0] sm:$0xff]  ;;  %v1128_v13 = vld [vmem:[#allocation7 + $0x98] sm:$0xff] }
 0x186   : > { %v444_v19 = vadd.f32 %v1884_v18, %v1660_v45  ;;  %v438_v20 = vpop.f32.mrb[13].mxu0  ;;  %v952_v18 = vld [vmem:[#allocation7 + $0x250] sm:$0xff] }
 0x187   : > { %1935 = vmatprep.mubr.f32.mxu1 %v467_v17  ;;  %v439_v21 = vadd.f32 %v1660_v45, %v438_v20  ;;  %2217 = vmatprep.subr.bf16.mxu1 %v2216_v11 }
 0x188   : > { %1936 = vmatmul.mubr.f32.gmra.mrb[10].mxu1 %v468_v16  ;;  %v470_v22 = vmax.f32 %v444_v19, 0.0  ;;  %v951_v16 = vld [vmem:[#allocation7 + $0x218] sm:$0xff]  ;;  %v953_v19 = vld [vmem:[#allocation7 + $0x288] sm:$0xff] }
 0x189   : > { %v469_v23 = vmax.f32 %v439_v21, 0.0  ;;  %v1887_v24 = vpop.f32.mrb[14].mxu0  ;;  %2219 = vmatpush3.bf16.msra.mxu1 %v2216_v11  ;;  %v2224_v17 = vpack.c.bf16 %v951_v16, %v950_v15  ;;  %v2228_v20 = vpack.c.bf16 %v953_v19, %v952_v18  ;;  %v954_v21 = vld [vmem:[#allocation7 + $0x2c0] sm:$0xff]  ;;  %v848_v18 = vld [vmem:[%s2821_s11 + $0x10] sm:$0xff] }
 0x18a   : > { %v454_v25 = vadd.f32 %v1887_v24, %v1660_v45  ;;  %v448_v26 = vpop.f32.mrb[15].mxu0  ;;  %2221 = vmatprep.subr.bf16.mxu1 %v2220_v14  ;;  %v956_v24 = vld [vmem:[#allocation7 + $0x330] sm:$0xff] }
 0x18b   : > { %1938 = vmatprep.mubr.f32.mxu1 %v469_v23  ;;  %v449_v27 = vadd.f32 %v1660_v45, %v448_v26 }
 0x18c   : > { %1939 = vmatmul.mubr.f32.gmra.mrb[12].mxu1 %v470_v22  ;;  %v472_v28 = vmax.f32 %v454_v25, 0.0  ;;  %v955_v22 = vld [vmem:[#allocation7 + $0x2f8] sm:$0xff]  ;;  %v957_v25 = vld [vmem:[#allocation7 + $0x368] sm:$0xff] }
 0x18d   : > { %v471_v29 = vmax.f32 %v449_v27, 0.0  ;;  %2223 = vmatpush3.bf16.msra.mxu1 %v2220_v14  ;;  %v2232_v23 = vpack.c.bf16 %v955_v22, %v954_v21  ;;  %v2236_v26 = vpack.c.bf16 %v957_v25, %v956_v24  ;;  %v1126_v27 = vld [vmem:[#allocation7 + $0x28] sm:$0xff]  ;;  %v1129_v14 = vld [vmem:[#allocation7 + $0xd0] sm:$0xff] }
 0x18e   : > { %2225 = vmatprep.subr.bf16.mxu1 %v2224_v17  ;;  %v2244_v22 = vpack.c.bf16 %v1129_v14, %v1128_v13 }
 0x18f   : > { %1941 = vmatprep.mubr.f32.mxu1 %v471_v29 }
 0x190   : > { %1942 = vmatmul.mubr.f32.gmra.mrb[14].mxu1 %v472_v28  ;;  %v1127_v28 = vld [vmem:[#allocation7 + $0x60] sm:$0xff] }
 0x191   : > { %2227 = vmatpush3.bf16.msra.mxu1 %v2224_v17  ;;  %v2869_v29 = vpack.c.bf16 %v1127_v28, %v1126_v27  ;;  %v1131_v27 = vld [vmem:[#allocation7 + $0x140] sm:$0xff] }
 0x192   : > { %2229 = vmatprep.subr.bf16.mxu1 %v2228_v20 }
 0x195   : > { %2231 = vmatpush3.bf16.msra.mxu1 %v2228_v20 }
 0x196   : > { %2233 = vmatprep.subr.bf16.mxu1 %v2232_v23 }
 0x199   : > { %2235 = vmatpush3.bf16.msra.mxu1 %v2232_v23 }
 0x19a   : > { %2237 = vmatprep.subr.bf16.mxu1 %v2236_v26 }
 0x19d   : > { %2239 = vmatpush3.bf16.msra.mxu1 %v2236_v26  ;;  %v1130_v26 = vld [vmem:[#allocation7 + $0x108] sm:$0xff] }
 0x19e   : > { %2241 = vmatprep.subr.bf16.mxu1 %v2869_v29 }
 0x247   : > { %v1922_v41 = vpop.f32.mrb[0].mxu1 }
 0x248   : > { %v562_v42 = vpop.f32.mrb[1].mxu1  ;;  %v568_v46 = vadd.f32 %v1922_v41, %v1661_v40 }
 0x249   : > { %v563_v43 = vadd.f32 %v1661_v40, %v562_v42 }
 0x24b   : > { %750 = vmatmul.mubr.f32.vlgmr.msra.gmra.mrb[16].mxu0 %v563_v43  ;;  %v1925_v44 = vpop.f32.mrb[2].mxu1 }
 0x24c   : > { %v572_v45 = vpop.f32.mrb[3].mxu1  ;;  %755 = vmatprep.mubr.f32.mxu0 %v2594_v33  ;;  %v578_v52 = vadd.f32 %v1925_v44, %v1661_v40 }
 0x24d   : > { %v573_v49 = vadd.f32 %v1661_v40, %v572_v45 }
 0x24f   : > { %756 = vmatmul.mubr.f32.gmra.mrb[18].mxu0 %v568_v46  ;;  %v1928_v47 = vpop.f32.mrb[4].mxu1 }
 0x250   : > { %761 = vmatprep.mubr.f32.mxu0 %v2594_v33  ;;  %v582_v48 = vpop.f32.mrb[5].mxu1  ;;  %v588_v58 = vadd.f32 %v1928_v47, %v1661_v40 }
 0x251   : > { %v583_v55 = vadd.f32 %v1661_v40, %v582_v48 }
 0x253   : > { %762 = vmatmul.mubr.f32.gmra.mrb[20].mxu0 %v573_v49  ;;  %v1931_v50 = vpop.f32.mrb[6].mxu1 }
 0x254   : > { %767 = vmatprep.mubr.f32.mxu0 %v2594_v33  ;;  %v592_v51 = vpop.f32.mrb[7].mxu1  ;;  %v598_v0 = vadd.f32 %v1931_v50, %v1661_v40 }
 0x255   : > { %v593_v61 = vadd.f32 %v1661_v40, %v592_v51 }
 0x257   : > { %768 = vmatmul.mubr.f32.gmra.mrb[22].mxu0 %v578_v52  ;;  %v1934_v53 = vpop.f32.mrb[8].mxu1 }
 0x258   : > { %773 = vmatprep.mubr.f32.mxu0 %v2594_v33  ;;  %v602_v54 = vpop.f32.mrb[9].mxu1  ;;  %v608_v2 = vadd.f32 %v1934_v53, %v1661_v40 }
 0x259   : > { %v603_v1 = vadd.f32 %v1661_v40, %v602_v54 }
 0x25b   : > { %774 = vmatmul.mubr.f32.gmra.mrb[24].mxu0 %v583_v55  ;;  %v1937_v56 = vpop.f32.mrb[10].mxu1 }
 0x25c   : > { %779 = vmatprep.mubr.f32.mxu0 %v2594_v33  ;;  %v612_v57 = vpop.f32.mrb[11].mxu1  ;;  %v618_v4 = vadd.f32 %v1937_v56, %v1661_v40 }
 0x25d   : > { %v613_v3 = vadd.f32 %v1661_v40, %v612_v57 }
 0x25f   : > { %780 = vmatmul.mubr.f32.gmra.mrb[26].mxu0 %v588_v58  ;;  %v1940_v59 = vpop.f32.mrb[12].mxu1 }
 0x260   : > { %785 = vmatprep.mubr.f32.mxu0 %v2594_v33  ;;  %v622_v60 = vpop.f32.mrb[13].mxu1  ;;  %v628_v6 = vadd.f32 %v1940_v59, %v1661_v40 }
 0x261   : > { %v623_v5 = vadd.f32 %v1661_v40, %v622_v60 }
 0x263   : > { %786 = vmatmul.mubr.f32.gmra.mrb[28].mxu0 %v593_v61  ;;  %v1943_v62 = vpop.f32.mrb[14].mxu1  ;;  %v846_v61 = vld [vmem:[%s2821_s11] sm:$0xff] }
 0x264   : > { %791 = vmatprep.mubr.f32.mxu0 %v2594_v33  ;;  %v632_v63 = vpop.f32.mrb[15].mxu1  ;;  %v638_v8 = vadd.f32 %v1943_v62, %v1661_v40 }
 0x265   : > { %v633_v7 = vadd.f32 %v1661_v40, %v632_v63 }
 0x267   : > { %792 = vmatmul.mubr.f32.gmra.mrb[30].mxu0 %v598_v0 }
 0x268   : > { %797 = vmatprep.mubr.f32.mxu0 %v2594_v33 }
 0x26b   : > { %798 = vmatmul.mubr.f32.gmra.mrb[32].mxu0 %v603_v1 }
 0x26c   : > { %803 = vmatprep.mubr.f32.mxu0 %v2594_v33 }
 0x26f   : > { %804 = vmatmul.mubr.f32.gmra.mrb[34].mxu0 %v608_v2 }
 0x270   : > { %809 = vmatprep.mubr.f32.mxu0 %v2594_v33 }
 0x273   : > { %810 = vmatmul.mubr.f32.gmra.mrb[36].mxu0 %v613_v3 }
 0x274   : > { %815 = vmatprep.mubr.f32.mxu0 %v2594_v33 }
 0x277   : > { %816 = vmatmul.mubr.f32.gmra.mrb[38].mxu0 %v618_v4 }
 0x278   : > { %821 = vmatprep.mubr.f32.mxu0 %v2594_v33 }
 0x27b   : > { %822 = vmatmul.mubr.f32.gmra.mrb[40].mxu0 %v623_v5 }
 0x27c   : > { %827 = vmatprep.mubr.f32.mxu0 %v2594_v33 }
 0x27f   : > { %828 = vmatmul.mubr.f32.gmra.mrb[42].mxu0 %v628_v6  ;;  %v847_v6 = vld [vmem:[%s2821_s11 + $0x8] sm:$0xff] }
 0x280   : > { %833 = vmatprep.mubr.f32.mxu0 %v2594_v33 }
 0x283   : > { %834 = vmatmul.mubr.f32.gmra.mrb[44].mxu0 %v633_v7 }
 0x284   : > { %839 = vmatprep.mubr.f32.mxu0 %v2594_v33  ;;  %v673_v33 = vld [vmem:[%s3104_s3 + $0x2] sm:$0x3] }
 0x285   : > { %v2876_v35 = vrot.slane %v673_v33, %v677_v32  ;;  %v2878_v36 = vrot.slane %v673_v33, %v681_v34  ;;  %v849_v32 = vld [vmem:[%s2821_s11 + $0x18] sm:$0xff] }
 0x287   : > { %840 = vmatmul.mubr.f32.gmra.mrb[46].mxu0 %v638_v8 }
 0x31e   : > { %v751_v37 = vpop.f32.mrb[16].mxu0 }
 0x31f   : > { %v752_v38 = vadd.f32 %v751_v37, %v2876_v35  ;;  %v753_v39 = vpop.f32.mrb[17].mxu0 }
 0x320   : > { %v754_v40 = vadd.f32 %v753_v39, %v2878_v36 }
 0x321   : > { %1494 = vst [vmem:[%s2882_s7 + $0x8] sm:$0xff] %v752_v38 }
 0x322   : > { %v862_v41 = vmul.f32 0.5, %v754_v40  ;;  %1510 = vst [vmem:[%s2882_s7 + $0x10] sm:$0xff] %v754_v40  ;;  %v757_v42 = vpop.f32.mrb[18].mxu0 }
 0x323   : > { %v758_v43 = vadd.f32 %v757_v42, %v2876_v35  ;;  %v759_v44 = vpop.f32.mrb[19].mxu0  ;;  %v1132_v42 = vld [vmem:[#allocation7 + $0x178] sm:$0xff] }
 0x324   : > { %v878_v45 = vmul.f32 1.442695, %v862_v41  ;;  %v760_v46 = vadd.f32 %v759_v44, %v2878_v36 }
 0x325   : > { %1495 = vst [vmem:[%s2882_s7 + $0x20] sm:$0xff] %v758_v43 }
 0x326   : > { %2391 = vpow2.f32 %v878_v45  ;;  %v863_v47 = vmul.f32 0.5, %v760_v46  ;;  %1511 = vst [vmem:[%s2882_s7 + $0x28] sm:$0xff] %v760_v46  ;;  %v763_v48 = vpop.f32.mrb[20].mxu0  ;;  %v850_v46 = vld [vmem:[%s2821_s11 + $0x20] sm:$0xff] }
 0x327   : > { %v2891_v49 = vadd.f32 %v763_v48, %v2876_v35  ;;  %v765_v50 = vpop.f32.mrb[21].mxu0 }
 0x328   : > { %v880_v51 = vmul.f32 1.442695, %v863_v47  ;;  %v766_v52 = vadd.f32 %v765_v50, %v2878_v36 }
 0x329   : > { %1496 = vst [vmem:[%s2882_s7 + $0x38] sm:$0xff] %v2891_v49 }
 0x32a   : > { %2393 = vpow2.f32 %v880_v51  ;;  %v864_v53 = vmul.f32 0.5, %v766_v52  ;;  %1512 = vst [vmem:[%s2882_s7 + $0x40] sm:$0xff] %v766_v52  ;;  %v769_v54 = vpop.f32.mrb[22].mxu0 }
 0x32b   : > { %v2898_v55 = vadd.f32 %v769_v54, %v2876_v35  ;;  %v771_v56 = vpop.f32.mrb[23].mxu0  ;;  %v1134_v54 = vld [vmem:[#allocation7 + $0x1e8] sm:$0xff] }
 0x32c   : > { %v882_v57 = vmul.f32 1.442695, %v864_v53  ;;  %v772_v58 = vadd.f32 %v771_v56, %v2878_v36  ;;  %v1135_v56 = vld [vmem:[#allocation7 + $0x220] sm:$0xff] }
 0x32d   : > { %1497 = vst [vmem:[%s2882_s7 + $0x50] sm:$0xff] %v2898_v55 }
 0x32e   : > { %2395 = vpow2.f32 %v882_v57  ;;  %v865_v59 = vmul.f32 0.5, %v772_v58  ;;  %1513 = vst [vmem:[%s2882_s7 + $0x58] sm:$0xff] %v772_v58  ;;  %v775_v60 = vpop.f32.mrb[24].mxu0 }
 0x32f   : > { %v2906_v62 = vadd.f32 %v775_v60, %v2876_v35  ;;  %v777_v63 = vpop.f32.mrb[25].mxu0  ;;  %v851_v60 = vld [vmem:[%s2821_s11 + $0x28] sm:$0xff] }
 0x330   : > { %v2392_v0 = vpop.eup %2391  ;;  %v884_v1 = vmul.f32 1.442695, %v865_v59  ;;  %v778_v2 = vadd.f32 %v777_v63, %v2878_v36 }
 0x331   : > { %1498 = vst [vmem:[%s2882_s7 + $0x68] sm:$0xff] %v2906_v62  ;;  %v910_v3 = vmul.f32 %v2392_v0, %v846_v61  ;;  %v2256_v0 = vpack.c.bf16 %v1135_v56, %v1134_v54  ;;  %v856_v56 = vld [vmem:[%s2821_s11 + $0x50] sm:$0xff] }
 0x332   : > { %2397 = vpow2.f32 %v884_v1  ;;  %v866_v4 = vmul.f32 0.5, %v778_v2  ;;  %1514 = vst [vmem:[%s2882_s7 + $0x70] sm:$0xff] %v778_v2  ;;  %v781_v5 = vpop.f32.mrb[26].mxu0 }
 0x333   : > { %v2914_v7 = vadd.f32 %v781_v5, %v2876_v35  ;;  %v783_v8 = vpop.f32.mrb[27].mxu0  ;;  %v926_v9 = vadd.f32 %v910_v3, %v752_v38  ;;  %v2248_v38 = vpack.c.bf16 %v1131_v27, %v1130_v26  ;;  %v1137_v5 = vld [vmem:[#allocation7 + $0x290] sm:$0xff] }
 0x334   : > { %v2394_v10 = vpop.eup %2393  ;;  %v886_v11 = vmul.f32 1.442695, %v866_v4  ;;  %v784_v12 = vadd.f32 %v783_v8, %v2878_v36  ;;  %v1136_v4 = vld [vmem:[#allocation7 + $0x258] sm:$0xff] }
 0x335   : > { %1499 = vst [vmem:[%s2882_s7 + $0x80] sm:$0xff] %v2914_v7  ;;  %1976 = vmatprep.mubr.f32.mxu1 %v926_v9  ;;  %v911_v15 = vmul.f32 %v2394_v10, %v847_v6  ;;  %v852_v10 = vld [vmem:[%s2821_s11 + $0x30] sm:$0xff]  ;;  %v2260_v13 = vpack.c.bf16 %v1137_v5, %v1136_v4 }
 0x336   : > { %2399 = vpow2.f32 %v886_v11  ;;  %v867_v16 = vmul.f32 0.5, %v784_v12  ;;  %1515 = vst [vmem:[%s2882_s7 + $0x88] sm:$0xff] %v784_v12  ;;  %v787_v17 = vpop.f32.mrb[28].mxu0 }
 0x337   : > { %v2922_v19 = vadd.f32 %v787_v17, %v2876_v35  ;;  %v789_v20 = vpop.f32.mrb[29].mxu0  ;;  %v927_v21 = vadd.f32 %v911_v15, %v758_v43  ;;  %v1133_v43 = vld [vmem:[#allocation7 + $0x1b0] sm:$0xff]  ;;  %v1138_v17 = vld [vmem:[#allocation7 + $0x2c8] sm:$0xff] }
 0x338   : > { %v2396_v23 = vpop.eup %2395  ;;  %v888_v24 = vmul.f32 1.442695, %v867_v16  ;;  %v790_v25 = vadd.f32 %v789_v20, %v2878_v36  ;;  %v2252_v50 = vpack.c.bf16 %v1133_v43, %v1132_v42 }
 0x339   : > { %1500 = vst [vmem:[%s2882_s7 + $0x98] sm:$0xff] %v2922_v19  ;;  %1977 = vmatmul.mubr.f32.vlgmr.msra.gmra.mrb[16].mxu1 %v927_v21  ;;  %v912_v28 = vmul.f32 %v2396_v23, %v848_v18  ;;  %v1139_v18 = vld [vmem:[#allocation7 + $0x300] sm:$0xff]  ;;  %v853_v23 = vld [vmem:[%s2821_s11 + $0x38] sm:$0xff] }
 0x33a   : > { %2401 = vpow2.f32 %v888_v24  ;;  %v868_v30 = vmul.f32 0.5, %v790_v25  ;;  %1516 = vst [vmem:[%s2882_s7 + $0xa0] sm:$0xff] %v790_v25  ;;  %v793_v31 = vpop.f32.mrb[30].mxu0  ;;  %2243 = vmatpush3.bf16.msra.mxu1 %v2869_v29  ;;  %v2264_v26 = vpack.c.bf16 %v1139_v18, %v1138_v17  ;;  %v860_v17 = vld [vmem:[%s2821_s11 + $0x70] sm:$0xff] }
 0x33b   : > { %v2931_v33 = vadd.f32 %v793_v31, %v2876_v35  ;;  %v795_v34 = vpop.f32.mrb[31].mxu0  ;;  %v928_v37 = vadd.f32 %v912_v28, %v2891_v49  ;;  %2245 = vmatprep.subr.bf16.mxu1 %v2244_v22 }
 0x33c   : > { %v2398_v39 = vpop.eup %2397  ;;  %v890_v40 = vmul.f32 1.442695, %v868_v30  ;;  %v796_v41 = vadd.f32 %v795_v34, %v2878_v36 }
 0x33d   : > { %1501 = vst [vmem:[%s2882_s7 + $0xb0] sm:$0xff] %v2931_v33  ;;  %1979 = vmatprep.mubr.f32.mxu1 %v928_v37  ;;  %v913_v29 = vmul.f32 %v2398_v39, %v849_v32  ;;  %v854_v37 = vld [vmem:[%s2821_s11 + $0x40] sm:$0xff] }
 0x33e   : > { %2403 = vpow2.f32 %v890_v40  ;;  %v869_v44 = vmul.f32 0.5, %v796_v41  ;;  %1517 = vst [vmem:[%s2882_s7 + $0xb8] sm:$0xff] %v796_v41  ;;  %v799_v45 = vpop.f32.mrb[32].mxu0  ;;  %2247 = vmatpush3.bf16.msra.mxu1 %v2244_v22 }
 0x33f   : > { %v2940_v47 = vadd.f32 %v799_v45, %v2876_v35  ;;  %v801_v48 = vpop.f32.mrb[33].mxu0  ;;  %v929_v49 = vadd.f32 %v913_v29, %v2898_v55  ;;  %2249 = vmatprep.subr.bf16.mxu1 %v2248_v38  ;;  %v855_v45 = vld [vmem:[%s2821_s11 + $0x48] sm:$0xff] }
 0x340   : > { %v2400_v51 = vpop.eup %2399  ;;  %v892_v52 = vmul.f32 1.442695, %v869_v44  ;;  %v802_v53 = vadd.f32 %v801_v48, %v2878_v36 }
 0x341   : > { %1502 = vst [vmem:[%s2882_s7 + $0xc8] sm:$0xff] %v2940_v47  ;;  %1980 = vmatmul.mubr.f32.gmra.mrb[18].mxu1 %v929_v49  ;;  %v914_v57 = vmul.f32 %v2400_v51, %v850_v46 }
 0x342   : > { %2405 = vpow2.f32 %v892_v52  ;;  %v870_v58 = vmul.f32 0.5, %v802_v53  ;;  %1518 = vst [vmem:[%s2882_s7 + $0xd0] sm:$0xff] %v802_v53  ;;  %v805_v59 = vpop.f32.mrb[34].mxu0  ;;  %2251 = vmatpush3.bf16.msra.mxu1 %v2248_v38 }
 0x343   : > { %v2949_v55 = vadd.f32 %v805_v59, %v2876_v35  ;;  %v807_v61 = vpop.f32.mrb[35].mxu0  ;;  %v930_v63 = vadd.f32 %v914_v57, %v2906_v62  ;;  %2253 = vmatprep.subr.bf16.mxu1 %v2252_v50 }
 0x344   : > { %v2402_v1 = vpop.eup %2401  ;;  %v894_v2 = vmul.f32 1.442695, %v870_v58  ;;  %v808_v3 = vadd.f32 %v807_v61, %v2878_v36 }
 0x345   : > { %1503 = vst [vmem:[%s2882_s7 + $0xe0] sm:$0xff] %v2949_v55  ;;  %1982 = vmatprep.mubr.f32.mxu1 %v930_v63  ;;  %v915_v6 = vmul.f32 %v2402_v1, %v851_v60 }
 0x346   : > { %2407 = vpow2.f32 %v894_v2  ;;  %v871_v8 = vmul.f32 0.5, %v808_v3  ;;  %1519 = vst [vmem:[%s2882_s7 + $0xe8] sm:$0xff] %v808_v3  ;;  %v811_v9 = vpop.f32.mrb[36].mxu0  ;;  %2255 = vmatpush3.bf16.msra.mxu1 %v2252_v50  ;;  %v857_v2 = vld [vmem:[%s2821_s11 + $0x58] sm:$0xff] }
 0x347   : > { %v2958_v62 = vadd.f32 %v811_v9, %v2876_v35  ;;  %v813_v11 = vpop.f32.mrb[37].mxu0  ;;  %v931_v12 = vadd.f32 %v915_v6, %v2914_v7  ;;  %2257 = vmatprep.subr.bf16.mxu1 %v2256_v0 }
 0x348   : > { %v2404_v14 = vpop.eup %2403  ;;  %v896_v15 = vmul.f32 1.442695, %v871_v8  ;;  %v814_v16 = vadd.f32 %v813_v11, %v2878_v36  ;;  %v858_v11 = vld [vmem:[%s2821_s11 + $0x60] sm:$0xff] }
 0x349   : > { %1504 = vst [vmem:[%s2882_s7 + $0xf8] sm:$0xff] %v2958_v62  ;;  %1983 = vmatmul.mubr.f32.gmra.mrb[20].mxu1 %v931_v12  ;;  %v916_v20 = vmul.f32 %v2404_v14, %v852_v10  ;;  %v859_v14 = vld [vmem:[%s2821_s11 + $0x68] sm:$0xff] }
 0x34a   : > { %2409 = vpow2.f32 %v896_v15  ;;  %v872_v21 = vmul.f32 0.5, %v814_v16  ;;  %1520 = vst [vmem:[%s2882_s7 + $0x100] sm:$0xff] %v814_v16  ;;  %v817_v22 = vpop.f32.mrb[38].mxu0  ;;  %2259 = vmatpush3.bf16.msra.mxu1 %v2256_v0 }
 0x34b   : > { %v2967_v7 = vadd.f32 %v817_v22, %v2876_v35  ;;  %v819_v24 = vpop.f32.mrb[39].mxu0  ;;  %v932_v25 = vadd.f32 %v916_v20, %v2922_v19  ;;  %2261 = vmatprep.subr.bf16.mxu1 %v2260_v13  ;;  %v861_v22 = vld [vmem:[%s2821_s11 + $0x78] sm:$0xff] }
 0x34c   : > { %v2406_v27 = vpop.eup %2405  ;;  %v898_v28 = vmul.f32 1.442695, %v872_v21  ;;  %v820_v30 = vadd.f32 %v819_v24, %v2878_v36 }
 0x34d   : > { %1505 = vst [vmem:[%s2882_s7 + $0x110] sm:$0xff] %v2967_v7  ;;  %1985 = vmatprep.mubr.f32.mxu1 %v932_v25  ;;  %v917_v31 = vmul.f32 %v2406_v27, %v853_v23  ;;  %v1141_v27 = vld [vmem:[#allocation7 + $0x370] sm:$0xff] }
 0x34e   : > { %2411 = vpow2.f32 %v898_v28  ;;  %v873_v32 = vmul.f32 0.5, %v820_v30  ;;  %1521 = vst [vmem:[%s2882_s7 + $0x118] sm:$0xff] %v820_v30  ;;  %v823_v34 = vpop.f32.mrb[40].mxu0  ;;  %2263 = vmatpush3.bf16.msra.mxu1 %v2260_v13  ;;  %v1310_v30 = vld [vmem:[#allocation7 + $0x30] sm:$0xff] }
 0x34f   : > { %v2976_v19 = vadd.f32 %v823_v34, %v2876_v35  ;;  %v825_v38 = vpop.f32.mrb[41].mxu0  ;;  %v933_v39 = vadd.f32 %v917_v31, %v2931_v33  ;;  %2265 = vmatprep.subr.bf16.mxu1 %v2264_v26  ;;  %v1311_v31 = vld [vmem:[#allocation7 + $0x68] sm:$0xff] }
 0x350   : > { %v2408_v40 = vpop.eup %2407  ;;  %v900_v41 = vmul.f32 1.442695, %v873_v32  ;;  %v826_v42 = vadd.f32 %v825_v38, %v2878_v36  ;;  %v1312_v32 = vld [vmem:[#allocation7 + $0xa0] sm:$0xff]  ;;  %v2272_v34 = vpack.c.bf16 %v1311_v31, %v1310_v30  ;;  %v1314_v38 = vld [vmem:[#allocation7 + $0x110] sm:$0xff] }
 0x351   : > { %1506 = vst [vmem:[%s2882_s7 + $0x128] sm:$0xff] %v2976_v19  ;;  %1986 = vmatmul.mubr.f32.gmra.mrb[22].mxu1 %v933_v39  ;;  %v918_v43 = vmul.f32 %v2408_v40, %v854_v37  ;;  %v1313_v37 = vld [vmem:[#allocation7 + $0xd8] sm:$0xff]  ;;  %v1315_v39 = vld [vmem:[#allocation7 + $0x148] sm:$0xff] }
 0x352   : > { %2413 = vpow2.f32 %v900_v41  ;;  %v874_v29 = vmul.f32 0.5, %v826_v42  ;;  %1522 = vst [vmem:[%s2882_s7 + $0x130] sm:$0xff] %v826_v42  ;;  %v829_v44 = vpop.f32.mrb[42].mxu0  ;;  %2267 = vmatpush3.bf16.msra.mxu1 %v2264_v26  ;;  %v1140_v26 = vld [vmem:[#allocation7 + $0x338] sm:$0xff]  ;;  %2273 = vmatprep.subr.bf16.mxu0 %v2272_v34  ;;  %v2280_v40 = vpack.c.bf16 %v1315_v39, %v1314_v38  ;;  %v1316_v41 = vld [vmem:[#allocation7 + $0x180] sm:$0xff] }
 0x353   : > { %v830_v33 = vadd.f32 %v829_v44, %v2876_v35  ;;  %v831_v46 = vpop.f32.mrb[43].mxu0  ;;  %v934_v48 = vadd.f32 %v918_v43, %v2940_v47  ;;  %v2268_v28 = vpack.c.bf16 %v1141_v27, %v1140_v26  ;;  %2275 = vmatpush3.bf16.msra.mxu0 %v2272_v34  ;;  %v1317_v42 = vld [vmem:[#allocation7 + $0x1b8] sm:$0xff]  ;;  %v1319_v44 = vld [vmem:[#allocation7 + $0x228] sm:$0xff]  ;;  %v1324_v38 = vld [vmem:[#allocation7 + $0x340] sm:$0xff] }
 0x354   : > { %v2410_v49 = vpop.eup %2409  ;;  %v902_v50 = vmul.f32 1.442695, %v874_v29  ;;  %v832_v51 = vadd.f32 %v831_v46, %v2878_v36  ;;  %v2284_v43 = vpack.c.bf16 %v1317_v42, %v1316_v41  ;;  %v1318_v29 = vld [vmem:[#allocation7 + $0x1f0] sm:$0xff]  ;;  %v1321_v46 = vld [vmem:[#allocation7 + $0x298] sm:$0xff]  ;;  %v1663_v41 = vld [vmem:[%s3104_s3 + $0x5] ss:$0 sm:$0xff] }
 0x355   : > { %1507 = vst [vmem:[%s2882_s7 + $0x140] sm:$0xff] %v830_v33  ;;  %1988 = vmatprep.mubr.f32.mxu1 %v934_v48  ;;  %v919_v52 = vmul.f32 %v2410_v49, %v855_v45  ;;  %2269 = vmatprep.subr.bf16.mxu1 %v2268_v28  ;;  %v2288_v45 = vpack.c.bf16 %v1319_v44, %v1318_v29  ;;  %v1322_v49 = vld [vmem:[#allocation7 + $0x2d0] sm:$0xff]  ;;  %v1325_v39 = vld [vmem:[#allocation7 + $0x378] sm:$0xff] }
 0x356   : > { %2415 = vpow2.f32 %v902_v50  ;;  %v875_v53 = vmul.f32 0.5, %v832_v51  ;;  %1523 = vst [vmem:[%s2882_s7 + $0x148] sm:$0xff] %v832_v51  ;;  %v835_v54 = vpop.f32.mrb[44].mxu0  ;;  %2271 = vmatpush3.bf16.msra.mxu1 %v2268_v28  ;;  %v1323_v50 = vld [vmem:[#allocation7 + $0x308] sm:$0xff] }
 0x357   : > { %v836_v57 = vadd.f32 %v835_v54, %v2876_v35  ;;  %v837_v58 = vpop.f32.mrb[45].mxu0  ;;  %v935_v47 = vadd.f32 %v919_v52, %v2949_v55  ;;  %2304 = vmatprep.subr.bf16.mxu1 %v2272_v34  ;;  %v2296_v51 = vpack.c.bf16 %v1323_v50, %v1322_v49  ;;  %v3010_v52 = vld [vmem:[%s3104_s3 + $0x4] ss:$0 sm:$0xff] }
 0x358   : > { %v2412_v59 = vpop.eup %2411  ;;  %v904_v60 = vmul.f32 1.442695, %v875_v53  ;;  %v838_v61 = vadd.f32 %v837_v58, %v2878_v36 }
 0x359   : > { %1508 = vst [vmem:[%s2882_s7 + $0x158] sm:$0xff] %v836_v57  ;;  %1989 = vmatmul.mubr.f32.gmra.mrb[24].mxu1 %v935_v47  ;;  %v920_v63 = vmul.f32 %v2412_v59, %v856_v56 }
 0x35a   : > { %2417 = vpow2.f32 %v904_v60  ;;  %v876_v0 = vmul.f32 0.5, %v838_v61  ;;  %1524 = vst [vmem:[%s2882_s7 + $0x160] sm:$0xff] %v838_v61  ;;  %v841_v1 = vpop.f32.mrb[46].mxu0 }
 0x35b   : > { %v842_v3 = vadd.f32 %v841_v1, %v2876_v35  ;;  %v843_v4 = vpop.f32.mrb[47].mxu0  ;;  %v936_v55 = vadd.f32 %v920_v63, %v2958_v62 }
 0x35c   : > { %v2414_v5 = vpop.eup %2413  ;;  %v906_v6 = vmul.f32 1.442695, %v876_v0  ;;  %v844_v8 = vadd.f32 %v843_v4, %v2878_v36 }
 0x35d   : > { %1509 = vst [vmem:[%s2882_s7 + $0x170] sm:$0xff] %v842_v3  ;;  %1991 = vmatprep.mubr.f32.mxu1 %v936_v55  ;;  %v921_v9 = vmul.f32 %v2414_v5, %v857_v2 }
 0x35e   : > { %2419 = vpow2.f32 %v906_v6  ;;  %v877_v10 = vmul.f32 0.5, %v844_v8  ;;  %1525 = vst [vmem:[%s2882_s7 + $0x178] sm:$0xff] %v844_v8 }
 0x35f   : > { %v937_v12 = vadd.f32 %v921_v9, %v2967_v7 }
 0x360   : > { %v2416_v35 = vpop.eup %2415  ;;  %v908_v13 = vmul.f32 1.442695, %v877_v10 }
 0x361   : > { %1992 = vmatmul.mubr.f32.gmra.mrb[26].mxu1 %v937_v12  ;;  %v922_v62 = vmul.f32 %v2416_v35, %v858_v11 }
 0x362   : > { %2421 = vpow2.f32 %v908_v13 }
 0x363   : > { %v938_v15 = vadd.f32 %v922_v62, %v2976_v19  ;;  %v2276_v19 = vpack.c.bf16 %v1313_v37, %v1312_v32 }
 0x364   : > { %v2418_v36 = vpop.eup %2417 }
 0x365   : > { %1994 = vmatprep.mubr.f32.mxu1 %v938_v15  ;;  %v923_v16 = vmul.f32 %v2418_v36, %v859_v14  ;;  %2277 = vmatprep.subr.bf16.mxu0 %v2276_v19 }
 0x366   : > { %2279 = vmatpush3.bf16.msra.mxu0 %v2276_v19 }
 0x367   : > { %v939_v18 = vadd.f32 %v923_v16, %v830_v33  ;;  %2281 = vmatprep.subr.bf16.mxu0 %v2280_v40  ;;  %v1320_v33 = vld [vmem:[#allocation7 + $0x260] sm:$0xff] }
 0x368   : > { %v2420_v20 = vpop.eup %2419  ;;  %v2292_v48 = vpack.c.bf16 %v1321_v46, %v1320_v33 }
 0x369   : > { %1995 = vmatmul.mubr.f32.gmra.mrb[28].mxu1 %v939_v18  ;;  %v924_v21 = vmul.f32 %v2420_v20, %v860_v17 }
 0x36a   : > { %2283 = vmatpush3.bf16.msra.mxu0 %v2280_v40 }
 0x36b   : > { %v940_v23 = vadd.f32 %v924_v21, %v836_v57  ;;  %2285 = vmatprep.subr.bf16.mxu0 %v2284_v43 }
 0x36c   : > { %v2422_v7 = vpop.eup %2421 }
 0x36d   : > { %1997 = vmatprep.mubr.f32.mxu1 %v940_v23  ;;  %v925_v24 = vmul.f32 %v2422_v7, %v861_v22 }
 0x36e   : > { %2287 = vmatpush3.bf16.msra.mxu0 %v2284_v43 }
 0x36f   : > { %v941_v25 = vadd.f32 %v925_v24, %v842_v3  ;;  %2289 = vmatprep.subr.bf16.mxu0 %v2288_v45 }
 0x371   : > { %1998 = vmatmul.mubr.f32.gmra.mrb[30].mxu1 %v941_v25 }
 0x372   : > { %2291 = vmatpush3.bf16.msra.mxu0 %v2288_v45 }
 0x373   : > { %2293 = vmatprep.subr.bf16.mxu0 %v2292_v48 }
 0x376   : > { %2295 = vmatpush3.bf16.msra.mxu0 %v2292_v48 }
 0x377   : > { %2297 = vmatprep.subr.bf16.mxu0 %v2296_v51 }
 0x37a   : > { %2299 = vmatpush3.bf16.msra.mxu0 %v2296_v51 }
 0x40c   : > { %v1978_v53 = vpop.f32.mrb[16].mxu1 }
 0x40d   : > { %v1037_v54 = vadd.f32 %v1978_v53, %v3010_v52  ;;  %v1031_v56 = vpop.f32.mrb[17].mxu1 }
 0x40e   : > { %v1032_v57 = vadd.f32 %v3010_v52, %v1031_v56 }
 0x40f   : > { %v1111_v47 = vmax.f32 %v1037_v54, 0.0 }
 0x410   : > { %v1110_v58 = vmax.f32 %v1032_v57, 0.0 }
 0x412   : > { %2032 = vmatprep.mubr.f32.mxu1 %v1110_v58 }
 0x413   : > { %2033 = vmatmul.mubr.f32.vlgmr.msra.gmra.mrb[32].mxu1 %v1111_v47 }
 0x414   : > { %v1981_v59 = vpop.f32.mrb[18].mxu1  ;;  %2312 = vmatpush3.bf16.msra.mxu1 %v2272_v34 }
 0x415   : > { %v1047_v60 = vadd.f32 %v1981_v59, %v3010_v52  ;;  %v1041_v61 = vpop.f32.mrb[19].mxu1  ;;  %2305 = vmatprep.subr.bf16.mxu1 %v2276_v19 }
 0x416   : > { %v1042_v63 = vadd.f32 %v3010_v52, %v1041_v61 }
 0x417   : > { %v1113_v1 = vmax.f32 %v1047_v60, 0.0 }
 0x418   : > { %v1112_v0 = vmax.f32 %v1042_v63, 0.0  ;;  %2313 = vmatpush3.bf16.msra.mxu1 %v2276_v19 }
 0x419   : > { %2306 = vmatprep.subr.bf16.mxu1 %v2280_v40 }
 0x41a   : > { %2035 = vmatprep.mubr.f32.mxu1 %v1112_v0 }
 0x41b   : > { %2036 = vmatmul.mubr.f32.gmra.mrb[34].mxu1 %v1113_v1 }
 0x41c   : > { %v1984_v2 = vpop.f32.mrb[20].mxu1  ;;  %2314 = vmatpush3.bf16.msra.mxu1 %v2280_v40  ;;  %v2300_v40 = vpack.c.bf16 %v1325_v39, %v1324_v38 }
 0x41d   : > { %v1057_v3 = vadd.f32 %v1984_v2, %v3010_v52  ;;  %v1051_v4 = vpop.f32.mrb[21].mxu1  ;;  %2307 = vmatprep.subr.bf16.mxu1 %v2284_v43 }
 0x41e   : > { %v1052_v55 = vadd.f32 %v3010_v52, %v1051_v4  ;;  %2301 = vmatprep.subr.bf16.mxu0 %v2300_v40 }
 0x41f   : > { %v1115_v6 = vmax.f32 %v1057_v3, 0.0  ;;  %2303 = vmatpush3.bf16.msra.mxu0 %v2300_v40 }
 0x420   : > { %v1114_v5 = vmax.f32 %v1052_v55, 0.0  ;;  %2315 = vmatpush3.bf16.msra.mxu1 %v2284_v43 }
 0x421   : > { %2308 = vmatprep.subr.bf16.mxu1 %v2288_v45 }
 0x422   : > { %2038 = vmatprep.mubr.f32.mxu1 %v1114_v5 }
 0x423   : > { %2039 = vmatmul.mubr.f32.gmra.mrb[36].mxu1 %v1115_v6 }
 0x424   : > { %v1987_v8 = vpop.f32.mrb[22].mxu1  ;;  %2316 = vmatpush3.bf16.msra.mxu1 %v2288_v45 }
 0x425   : > { %v1067_v9 = vadd.f32 %v1987_v8, %v3010_v52  ;;  %v1061_v10 = vpop.f32.mrb[23].mxu1  ;;  %2309 = vmatprep.subr.bf16.mxu1 %v2292_v48 }
 0x426   : > { %v1062_v11 = vadd.f32 %v3010_v52, %v1061_v10 }
 0x427   : > { %v1117_v35 = vmax.f32 %v1067_v9, 0.0 }
 0x428   : > { %v1116_v12 = vmax.f32 %v1062_v11, 0.0  ;;  %2317 = vmatpush3.bf16.msra.mxu1 %v2292_v48 }
 0x429   : > { %2310 = vmatprep.subr.bf16.mxu1 %v2296_v51 }
 0x42a   : > { %2041 = vmatprep.mubr.f32.mxu1 %v1116_v12 }
 0x42b   : > { %2042 = vmatmul.mubr.f32.gmra.mrb[38].mxu1 %v1117_v35 }
 0x42c   : > { %v1990_v13 = vpop.f32.mrb[24].mxu1  ;;  %2318 = vmatpush3.bf16.msra.mxu1 %v2296_v51 }
 0x42d   : > { %v1077_v62 = vadd.f32 %v1990_v13, %v3010_v52  ;;  %v1071_v14 = vpop.f32.mrb[25].mxu1  ;;  %2311 = vmatprep.subr.bf16.mxu1 %v2300_v40 }
 0x42e   : > { %v1072_v15 = vadd.f32 %v3010_v52, %v1071_v14 }
 0x42f   : > { %v1119_v16 = vmax.f32 %v1077_v62, 0.0 }
 0x430   : > { %v1118_v36 = vmax.f32 %v1072_v15, 0.0  ;;  %2319 = vmatpush3.bf16.msra.mxu1 %v2300_v40 }
 0x432   : > { %2044 = vmatprep.mubr.f32.mxu1 %v1118_v36 }
 0x433   : > { %2045 = vmatmul.mubr.f32.gmra.mrb[40].mxu1 %v1119_v16 }
 0x434   : > { %v1993_v17 = vpop.f32.mrb[26].mxu1 }
 0x435   : > { %v1087_v18 = vadd.f32 %v1993_v17, %v3010_v52  ;;  %v1081_v20 = vpop.f32.mrb[27].mxu1 }
 0x436   : > { %v1082_v21 = vadd.f32 %v3010_v52, %v1081_v20 }
 0x437   : > { %v1121_v23 = vmax.f32 %v1087_v18, 0.0 }
 0x438   : > { %v1120_v22 = vmax.f32 %v1082_v21, 0.0 }
 0x43a   : > { %2047 = vmatprep.mubr.f32.mxu1 %v1120_v22 }
 0x43b   : > { %2048 = vmatmul.mubr.f32.gmra.mrb[42].mxu1 %v1121_v23 }
 0x43c   : > { %v1996_v7 = vpop.f32.mrb[28].mxu1 }
 0x43d   : > { %v1097_v24 = vadd.f32 %v1996_v7, %v3010_v52  ;;  %v1091_v25 = vpop.f32.mrb[29].mxu1  ;;  %v1664_v7 = vld [vmem:[%s3104_s3 + $0x6] ss:$0 sm:$0xff] }
 0x43e   : > { %v1092_v26 = vadd.f32 %v3010_v52, %v1091_v25 }
 0x43f   : > { %v1123_v28 = vmax.f32 %v1097_v24, 0.0 }
 0x440   : > { %v1122_v27 = vmax.f32 %v1092_v26, 0.0 }
 0x442   : > { %2050 = vmatprep.mubr.f32.mxu1 %v1122_v27 }
 0x443   : > { %2051 = vmatmul.mubr.f32.gmra.mrb[44].mxu1 %v1123_v28 }
 0x444   : > { %v1999_v30 = vpop.f32.mrb[30].mxu1 }
 0x445   : > { %v1107_v31 = vadd.f32 %v1999_v30, %v3010_v52  ;;  %v1101_v32 = vpop.f32.mrb[31].mxu1 }
 0x446   : > { %v1102_v34 = vadd.f32 %v3010_v52, %v1101_v32 }
 0x447   : > { %v1125_v19 = vmax.f32 %v1107_v31, 0.0 }
 0x448   : > { %v1124_v37 = vmax.f32 %v1102_v34, 0.0 }
 0x44a   : > { %2053 = vmatprep.mubr.f32.mxu1 %v1124_v37 }
 0x44b   : > { %2054 = vmatmul.mubr.f32.gmra.mrb[46].mxu1 %v1125_v19 }
 0x4e6   : > { %v2034_v42 = vpop.f32.mrb[32].mxu1 }
 0x4e7   : > { %v1221_v43 = vadd.f32 %v2034_v42, %v1663_v41  ;;  %v1215_v29 = vpop.f32.mrb[33].mxu1 }
 0x4e8   : > { %v1216_v44 = vadd.f32 %v1663_v41, %v1215_v29 }
 0x4e9   : > { %v1295_v33 = vmax.f32 %v1221_v43, 0.0 }
 0x4ea   : > { %v1294_v45 = vmax.f32 %v1216_v44, 0.0 }
 0x4ec   : > { %2088 = vmatprep.mubr.f32.mxu0 %v1294_v45 }
 0x4ed   : > { %2089 = vmatmul.mubr.f32.vlgmr.msra.gmra.mrb[48].mxu0 %v1295_v33 }
 0x4ee   : > { %v2037_v46 = vpop.f32.mrb[34].mxu1 }
 0x4ef   : > { %v1231_v48 = vadd.f32 %v2037_v46, %v1663_v41  ;;  %v1225_v49 = vpop.f32.mrb[35].mxu1 }
 0x4f0   : > { %v1226_v50 = vadd.f32 %v1663_v41, %v1225_v49 }
 0x4f1   : > { %v1297_v52 = vmax.f32 %v1231_v48, 0.0 }
 0x4f2   : > { %v1296_v51 = vmax.f32 %v1226_v50, 0.0 }
 0x4f4   : > { %2091 = vmatprep.mubr.f32.mxu0 %v1296_v51 }
 0x4f5   : > { %2092 = vmatmul.mubr.f32.gmra.mrb[50].mxu0 %v1297_v52 }
 0x4f6   : > { %v2040_v53 = vpop.f32.mrb[36].mxu1 }
 0x4f7   : > { %v1241_v54 = vadd.f32 %v2040_v53, %v1663_v41  ;;  %v1235_v56 = vpop.f32.mrb[37].mxu1 }
 0x4f8   : > { %v1236_v57 = vadd.f32 %v1663_v41, %v1235_v56 }
 0x4f9   : > { %v1299_v47 = vmax.f32 %v1241_v54, 0.0 }
 0x4fa   : > { %v1298_v58 = vmax.f32 %v1236_v57, 0.0 }
 0x4fc   : > { %2094 = vmatprep.mubr.f32.mxu0 %v1298_v58 }
 0x4fd   : > { %2095 = vmatmul.mubr.f32.gmra.mrb[52].mxu0 %v1299_v47 }
 0x4fe   : > { %v2043_v59 = vpop.f32.mrb[38].mxu1 }
 0x4ff   : > { %v1251_v60 = vadd.f32 %v2043_v59, %v1663_v41  ;;  %v1245_v61 = vpop.f32.mrb[39].mxu1 }
 0x500   : > { %v1246_v63 = vadd.f32 %v1663_v41, %v1245_v61 }
 0x501   : > { %v1301_v1 = vmax.f32 %v1251_v60, 0.0 }
 0x502   : > { %v1300_v0 = vmax.f32 %v1246_v63, 0.0 }
 0x504   : > { %2097 = vmatprep.mubr.f32.mxu0 %v1300_v0 }
 0x505   : > { %2098 = vmatmul.mubr.f32.gmra.mrb[54].mxu0 %v1301_v1 }
 0x506   : > { %v2046_v2 = vpop.f32.mrb[40].mxu1 }
 0x507   : > { %v1261_v3 = vadd.f32 %v2046_v2, %v1663_v41  ;;  %v1255_v4 = vpop.f32.mrb[41].mxu1 }
 0x508   : > { %v1256_v55 = vadd.f32 %v1663_v41, %v1255_v4 }
 0x509   : > { %v1303_v6 = vmax.f32 %v1261_v3, 0.0 }
 0x50a   : > { %v1302_v5 = vmax.f32 %v1256_v55, 0.0 }
 0x50c   : > { %2100 = vmatprep.mubr.f32.mxu1 %v1302_v5 }
 0x50d   : > { %2101 = vmatmul.mubr.f32.vlgmr.msra.gmra.mrb[48].mxu1 %v1303_v6 }
 0x50e   : > { %v2049_v8 = vpop.f32.mrb[42].mxu1 }
 0x50f   : > { %v1271_v9 = vadd.f32 %v2049_v8, %v1663_v41  ;;  %v1265_v10 = vpop.f32.mrb[43].mxu1 }
 0x510   : > { %v1266_v11 = vadd.f32 %v1663_v41, %v1265_v10 }
 0x511   : > { %v1305_v35 = vmax.f32 %v1271_v9, 0.0 }
 0x512   : > { %v1304_v12 = vmax.f32 %v1266_v11, 0.0 }
 0x514   : > { %2103 = vmatprep.mubr.f32.mxu1 %v1304_v12 }
 0x515   : > { %2104 = vmatmul.mubr.f32.gmra.mrb[50].mxu1 %v1305_v35 }
 0x516   : > { %v2052_v13 = vpop.f32.mrb[44].mxu1 }
 0x517   : > { %v1281_v62 = vadd.f32 %v2052_v13, %v1663_v41  ;;  %v1275_v14 = vpop.f32.mrb[45].mxu1 }
 0x518   : > { %v1276_v15 = vadd.f32 %v1663_v41, %v1275_v14 }
 0x519   : > { %v1307_v16 = vmax.f32 %v1281_v62, 0.0 }
 0x51a   : > { %v1306_v36 = vmax.f32 %v1276_v15, 0.0 }
 0x51c   : > { %2106 = vmatprep.mubr.f32.mxu1 %v1306_v36 }
 0x51d   : > { %2107 = vmatmul.mubr.f32.gmra.mrb[52].mxu1 %v1307_v16 }
 0x51e   : > { %v2055_v17 = vpop.f32.mrb[46].mxu1 }
 0x51f   : > { %v1291_v18 = vadd.f32 %v2055_v17, %v1663_v41  ;;  %v1285_v20 = vpop.f32.mrb[47].mxu1 }
 0x520   : > { %v1286_v21 = vadd.f32 %v1663_v41, %v1285_v20 }
 0x521   : > { %v1309_v23 = vmax.f32 %v1291_v18, 0.0 }
 0x522   : > { %v1308_v22 = vmax.f32 %v1286_v21, 0.0 }
 0x524   : > { %2109 = vmatprep.mubr.f32.mxu1 %v1308_v22 }
 0x525   : > { %2110 = vmatmul.mubr.f32.gmra.mrb[54].mxu1 %v1309_v23 }
 0x5c0   : > { %v2090_v24 = vpop.f32.mrb[48].mxu0 }
 0x5c1   : > { %v1405_v25 = vadd.f32 %v2090_v24, %v1664_v7  ;;  %v1399_v26 = vpop.f32.mrb[49].mxu0 }
 0x5c2   : > { %v1400_v27 = vadd.f32 %v1664_v7, %v1399_v26 }
 0x5c3   : > { %1479 = vst [vmem:[%s2882_s7 + $0x18] sm:$0xff] %v1405_v25 }
 0x5c4   : > { %1478 = vst [vmem:[%s2882_s7] sm:$0xff] %v1400_v27 }
 0x5c8   : > { %v2093_v28 = vpop.f32.mrb[50].mxu0 }
 0x5c9   : > { %v1415_v30 = vadd.f32 %v2093_v28, %v1664_v7  ;;  %v1409_v31 = vpop.f32.mrb[51].mxu0 }
 0x5ca   : > { %v1410_v32 = vadd.f32 %v1664_v7, %v1409_v31 }
 0x5cb   : > { %1481 = vst [vmem:[%s2882_s7 + $0x48] sm:$0xff] %v1415_v30 }
 0x5cc   : > { %1480 = vst [vmem:[%s2882_s7 + $0x30] sm:$0xff] %v1410_v32 }
 0x5d0   : > { %v2096_v34 = vpop.f32.mrb[52].mxu0 }
 0x5d1   : > { %v1425_v37 = vadd.f32 %v2096_v34, %v1664_v7  ;;  %v1419_v19 = vpop.f32.mrb[53].mxu0 }
 0x5d2   : > { %v1420_v38 = vadd.f32 %v1664_v7, %v1419_v19 }
 0x5d3   : > { %1483 = vst [vmem:[%s2882_s7 + $0x78] sm:$0xff] %v1425_v37 }
 0x5d4   : > { %1482 = vst [vmem:[%s2882_s7 + $0x60] sm:$0xff] %v1420_v38 }
 0x5d8   : > { %v2099_v39 = vpop.f32.mrb[54].mxu0 }
 0x5d9   : > { %v1435_v40 = vadd.f32 %v2099_v39, %v1664_v7  ;;  %v1429_v41 = vpop.f32.mrb[55].mxu0 }
 0x5da   : > { %v1430_v42 = vadd.f32 %v1664_v7, %v1429_v41 }
 0x5db   : > { %1485 = vst [vmem:[%s2882_s7 + $0xa8] sm:$0xff] %v1435_v40 }
 0x5dc   : > { %1484 = vst [vmem:[%s2882_s7 + $0x90] sm:$0xff] %v1430_v42 }
 0x5e0   : > { %v2102_v43 = vpop.f32.mrb[48].mxu1 }
 0x5e1   : > { %v1445_v29 = vadd.f32 %v2102_v43, %v1664_v7  ;;  %v1439_v44 = vpop.f32.mrb[49].mxu1 }
 0x5e2   : > { %v1440_v45 = vadd.f32 %v1664_v7, %v1439_v44 }
 0x5e3   : > { %1487 = vst [vmem:[%s2882_s7 + $0xd8] sm:$0xff] %v1445_v29 }
 0x5e4   : > { %1486 = vst [vmem:[%s2882_s7 + $0xc0] sm:$0xff] %v1440_v45 }
 0x5e8   : > { %v2105_v33 = vpop.f32.mrb[50].mxu1 }
 0x5e9   : > { %v1455_v46 = vadd.f32 %v2105_v33, %v1664_v7  ;;  %v1449_v48 = vpop.f32.mrb[51].mxu1 }
 0x5ea   : > { %v1450_v49 = vadd.f32 %v1664_v7, %v1449_v48 }
 0x5eb   : > { %1489 = vst [vmem:[%s2882_s7 + $0x108] sm:$0xff] %v1455_v46 }
 0x5ec   : > { %1488 = vst [vmem:[%s2882_s7 + $0xf0] sm:$0xff] %v1450_v49 }
 0x5f0   : > { %v2108_v50 = vpop.f32.mrb[52].mxu1 }
 0x5f1   : > { %v1465_v51 = vadd.f32 %v2108_v50, %v1664_v7  ;;  %v1459_v52 = vpop.f32.mrb[53].mxu1 }
 0x5f2   : > { %v1460_v53 = vadd.f32 %v1664_v7, %v1459_v52 }
 0x5f3   : > { %1491 = vst [vmem:[%s2882_s7 + $0x138] sm:$0xff] %v1465_v51 }
 0x5f4   : > { %1490 = vst [vmem:[%s2882_s7 + $0x120] sm:$0xff] %v1460_v53 }
 0x5f8   : > { %v2111_v54 = vpop.f32.mrb[54].mxu1 }
 0x5f9   : > { %v1475_v56 = vadd.f32 %v2111_v54, %v1664_v7  ;;  %v1469_v57 = vpop.f32.mrb[55].mxu1 }
 0x5fa   : > { %v1470_v58 = vadd.f32 %v1664_v7, %v1469_v57 }
 0x5fb   : > { %1493 = vst [vmem:[%s2882_s7 + $0x168] sm:$0xff] %v1475_v56 }
 0x5fc   : > { %1492 = vst [vmem:[%s2882_s7 + $0x150] sm:$0xff] %v1470_v58 }
 0x5fd   : > { %2524 = shalt.err (!%p2521_p6)
}
 0x5fe   : > { %s2525_s14 = scalar_lea.hbm %s3053_s13, 6144  ;;  %s2529_s5 = scalar_lea.hbm %s3105_s4, 12288 }
 0x5ff   : > { %p2526_p8 = scmp.ne.s32.totalorder %s3053_s13, %s2525_s14  ;;  %p2530_p4 = scmp.lt.u32.totalorder %s3053_s13, %s3105_s4 }
 0x600   : > { %p2531_p11 = scmp.lt.u32.totalorder %s2529_s5, %s2525_s14  ;;  %p2533_p3 = scmp.lt.u32.totalorder %s2525_s14, %s3053_s13 }
 0x601   : > { %p2527_p10 = pnand %p2526_p8, %p2714_p12 }
 0x602   : > { %p2532_p13 = por %p2531_p11, %p2530_p4 }
 0x603   : > { %p2528_p0 = pneg %p2527_p10 }
 0x604   : > { %p2534_p7 = por %p2533_p3, %p2532_p13 }
 0x606   : > { %p2535_p9 = pnand %p2534_p7, %p2528_p0 }
 0x608   : > { %2538 = shalt.err (!%p2535_p9)
}
 0x609   : > { %s2596_s6 = smov 384   ;;  %s2597_s29 = smov 24  }
 0x60a   : > { %2330 = dma.vmem_to_hbm [thread:$0]  (%p2714_p12), %s3055_s23, 6144, %s3053_s13, %s1527_s26, %s2596_s6, %s2596_s6, %s2597_s29  }
 0x60b PF: > { %s1556_s9 = sand.u32 1, %s2573_s15   ;;  %p3122_p1 = scmp.ne.s32.totalorder %s3111_s22, 0 }
 0x60c   : > { %p3123_p5 = scmp.ge.s32.totalorder %s2585_s18, 2  ;;  %s1557_s11 = scalar_lea.sflag [#allocation4], %s1556_s9 }
 0x60e   : > { %p2344_p2 = pnand %p3123_p5, %p3122_p1 }
 0x610   : > { %2568 = dma.done.wait (!%p2344_p2), %s1557_s11, 6144  }
 0x611   : > { %2570 = vsyncadd (!%p2344_p2), %s1557_s11, 4294961152  ;;  %p20_p6 = scmp.ge.s32.totalorder %s2679_s27, 4   ;;  %s3124_s15 = smov %s2577_s16 }
 0x612   : > { %s3125_s16 = smov %s2581_s17  ;;  %s3126_s17 = smov %s2710_s24 }
 0x613   : > { %s3127_s18 = smov %s2679_s27  ;;  %22 = sbr.rel (!%p20_p6) target bundleno = 9 (0x9), region = 98 }
 0x61a   :  { %1562 = vsyncpa [#allocation3], 1 }
 0x61b   :  { %1564 = vsyncpa [#allocation3 + $0x1], 1 }
 0x61c   :  { %1565 = vsyncpa [#allocation6], 1 }
 0x61d   :  { %1567 = vsyncpa [#allocation6 + $0x1], 1 }
 0x61e   :  { %1568 = vsyncpa [#allocation4], 1 }
 0x61f   :  { %1570 = vsyncpa [#allocation4 + $0x1], 1 }

</bundles_post_ra>
